<compile_context>
chip_gen: v6e
topology: v6e:2x2x1
jax: 0.10.0
libtpu: 0.0.40
codegen_flags: <defaults>
</compile_context>

<pallas_src>
import numpy as np
import jax
import jax.numpy as jnp
from jax import lax
from jax.experimental import pallas as pl
from jax.experimental.pallas import tpu as pltpu

WINDOW_SIZE = 11
SIGMA = 1.5
SSIM_WEIGHT = 5.0
MSE_WEIGHT = 1.0
LOG_SIGMA_MSE = 0.0     # nn.Parameter init in __init__
LOG_SIGMA_SSIM = -1.6   # nn.Parameter init in __init__
C1 = 0.01 ** 2
C2 = 0.03 ** 2
PAD = WINDOW_SIZE // 2


def _gaussian_1d(ws, sigma):
    xs = np.arange(ws, dtype=np.float64) - ws // 2
    g = np.exp(-(xs ** 2) / (2.0 * sigma ** 2))
    return (g / g.sum()).astype(np.float32)


_GAUSS = _gaussian_1d(WINDOW_SIZE, SIGMA)


def _band_matrix(n):
    """Symmetric banded Gaussian matrix B, B[c, j] = g[c-j+PAD] for |c-j|<=PAD.

    (X @ B)[i, j] == zero-padded 1-D Gaussian convolution of row i along the
    last axis, so the wrapper needs no jnp.pad of the inputs.
    """
    idx = np.arange(n)
    d = idx[:, None] - idx[None, :]
    band = np.zeros((n, n), dtype=np.float32)
    m = np.abs(d) <= PAD
    band[m] = _GAUSS[(d + PAD)[m]]
    return band


def _blur2d_operator(h, w):
    """(H*W, H*W) operator: flat_img @ B2D == flatten(GH @ img @ GW)."""
    return np.kron(_band_matrix(h), _band_matrix(w)).astype(np.float32)


def _vmem_limit_bytes():
    """Generation-aware VMEM limit: ~half of physical capacity.

    -> ~32 MiB on v7x (64 MiB physical), ~64 MiB on v5e/v6e (128 MiB)."""
    try:
        cap = int(pltpu.get_tpu_info().vmem_capacity_bytes)
    except Exception:
        cap = 64 * 1024 * 1024  # conservative v7x assumption
    return int(min(cap // 2, 96 * 1024 * 1024))


def _pick_tile_nc(nc, hw, vmem_limit):
    """Tile the N*C axis as fat as the VMEM budget allows.

    Per image: ~25x H*W*4 of in-kernel intermediates (stacked/blur/SSIM-map
    temporaries) + 2 inputs x 2 double-buffers.  Half the VMEM limit is kept
    as headroom for the resident B2D operator, outputs and compiler scratch.
    Keep >= 2 grid steps when possible so the 'parallel' axis can shard
    across the two v7x TensorCores.
    """
    per_image = (25 + 4) * hw * 4
    budget = vmem_limit // 2
    max_tile = max(1, budget // per_image)
    return max(1, min(max_tile, (nc + 1) // 2))


def _make_kernel(tile_nc, hw, r_lanes, sub_rows, nc_actual):
    """Per-tile partial sums of the SSIM map and of the squared error."""

    def kernel(b2d_ref, sr_ref, hr_ref, out_ref):
        # b2d_ref: VMEM (HW, HW)        resident Kronecker blur operator
        # sr_ref:  VMEM (1, T, HW)      T = N*C tile, images flattened to HW lanes
        # hr_ref:  VMEM (1, T, HW)
        # out_ref: VMEM (1, SUB, 128)   rows [0:R]=SSIM lane-partials,
        #                               rows [R:2R]=MSE lane-partials, rest 0
        x = sr_ref[0]                        # (T, HW)
        y = hr_ref[0]
        diff = x - y

        # ---- fused 2-D Gaussian blur of [x, y, x^2, y^2, x*y]: ONE matmul --
        stacked = jnp.concatenate([x, y, x * x, y * y, x * y], axis=0)  # (5T,HW)
        blur = jnp.dot(stacked, b2d_ref[...],
                       preferred_element_type=jnp.float32,
                       precision=lax.Precision.HIGHEST)                 # (5T,HW)
        blur = blur.reshape(5, tile_nc, hw)
        mu1, mu2, ex2, ey2, exy = blur[0], blur[1], blur[2], blur[3], blur[4]

        mu1_sq = mu1 * mu1
        mu2_sq = mu2 * mu2
        mu1_mu2 = mu1 * mu2
        sigma1_sq = ex2 - mu1_sq
        sigma2_sq = ey2 - mu2_sq
        sigma12 = exy - mu1_mu2

        num = (2.0 * mu1_mu2 + C1) * (2.0 * sigma12 + C2)
        den = (mu1_sq + mu2_sq + C1) * (sigma1_sq + sigma2_sq + C2)
        ssim_map = num / den                                            # (T,HW)

        # mask rows that belong to the zero-padded tail of the cdiv grid
        g = pl.program_id(0)
        row = g * tile_nc + lax.broadcasted_iota(jnp.int32, (tile_nc, 1), 0)
        valid = (row < nc_actual).astype(jnp.float32)                   # (T,1)

        # reduce only the batch (sublane) axis here; cross-lane reduce is
        # finished in the wrapper.  Lane-dense (R,128) partials.
        ssim_lanes = jnp.sum(ssim_map * valid, axis=0).reshape(r_lanes, 128)
        mse_lanes = jnp.sum(diff * diff * valid, axis=0).reshape(r_lanes, 128)

        parts = [ssim_lanes, mse_lanes]
        if sub_rows > 2 * r_lanes:
            parts.append(jnp.zeros((sub_rows - 2 * r_lanes, 128), jnp.float32))
        out_ref[...] = jnp.concatenate(parts, axis=0).reshape(1, sub_rows, 128)

    return kernel


def dynamic_composite_loss(sr, hr, epoch=None,
                           log_sigma_mse=LOG_SIGMA_MSE,
                           log_sigma_ssim=LOG_SIGMA_SSIM,
                           tile_nc=None):
    """sr, hr: (N, C, H, W) float32 in [0, 1].  Returns scalar loss."""
    N, C, H, W = sr.shape
    NC = N * C
    HW = H * W
    # The Kronecker-operator path targets small SR patches.
    # TODO(synk): large images (H*W > 1024) need the separable two-pass blur
    #             plus a spatial grid axis with +/-PAD halo; not implemented.
    assert HW % 128 == 0 and HW <= 1024, \
        "Kronecker blur path requires H*W <= 1024 and H*W % 128 == 0"
    R = HW // 128                      # lane-partial rows per quantity
    SUB = max(8, ((2 * R + 7) // 8) * 8)

    vmem_limit = _vmem_limit_bytes()
    if tile_nc is None:
        tile_nc = _pick_tile_nc(NC, HW, vmem_limit)
    grid = -(-NC // tile_nc)           # cdiv: no divisibility requirement
    NC_pad = grid * tile_nc

    sr_f = sr.reshape(NC, HW).astype(jnp.float32)
    hr_f = hr.reshape(NC, HW).astype(jnp.float32)
    if NC_pad != NC:
        sr_f = jnp.pad(sr_f, ((0, NC_pad - NC), (0, 0)))
        hr_f = jnp.pad(hr_f, ((0, NC_pad - NC), (0, 0)))
    sr3 = sr_f.reshape(grid, tile_nc, HW)
    hr3 = hr_f.reshape(grid, tile_nc, HW)

    # Static 2-D blur operator (zero padding folded into the band matrices).
    b2d = jnp.asarray(_blur2d_operator(H, W))

    kernel = _make_kernel(tile_nc, HW, R, SUB, NC)

    flops = int(2 * 5 * NC_pad * HW * HW + 30 * NC_pad * HW)
    bytes_accessed = int(4 * (2 * NC_pad * HW + HW * HW + grid * SUB * 128))
    cost = pl.CostEstimate(flops=flops, transcendentals=0,
                           bytes_accessed=bytes_accessed)

    out = pl.pallas_call(
        kernel,
        grid=(grid,),
        in_specs=[
            pl.BlockSpec((HW, HW), lambda g: (0, 0)),            # B2D resident
            pl.BlockSpec((1, tile_nc, HW), lambda g: (g, 0, 0)),  # SR tile
            pl.BlockSpec((1, tile_nc, HW), lambda g: (g, 0, 0)),  # HR tile
        ],
        out_specs=pl.BlockSpec((1, SUB, 128), lambda g: (g, 0, 0)),
        out_shape=jax.ShapeDtypeStruct((grid, SUB, 128), jnp.float32),
        compiler_params=pltpu.CompilerParams(
            dimension_semantics=("parallel",),
            vmem_limit_bytes=vmem_limit),
        cost_estimate=cost,
    )(b2d, sr3, hr3)

    denom = float(NC * H * W)
    l_ssim = 1.0 - jnp.sum(out[:, :R, :]) / denom
    l_mse = jnp.sum(out[:, R:2 * R, :]) / denom

    # Learnable-weight combine stays in JAX: traced, differentiable w.r.t. the
    # log-sigma parameters (matches the PyTorch forward exactly).
    # TODO(synk): pallas_call has no autodiff rule, so gradients w.r.t. sr/hr
    #             would need a custom_vjp backward kernel.
    # TODO(synk): torch.no_grad() stashing of current_*_weight (logging
    #             side-effect) is not reproduced.
    # NOTE: `epoch` must be a static Python scalar (Python min()), not traced.
    ls_mse = jnp.asarray(log_sigma_mse, dtype=jnp.float32)
    ls_ssim = jnp.asarray(log_sigma_ssim, dtype=jnp.float32)
    mse_w = jnp.exp(-ls_mse) * MSE_WEIGHT
    ssim_w = jnp.exp(-ls_ssim) * SSIM_WEIGHT
    if epoch is not None:
        ssim_w = ssim_w * min(1.0 + epoch / 10.0, 3.0)
    return mse_w * l_mse + ls_mse + ssim_w * l_ssim + ls_ssim


def _reference_loss(sr, hr, epoch=None,
                    log_sigma_mse=LOG_SIGMA_MSE, log_sigma_ssim=LOG_SIGMA_SSIM):
    """Pure-JAX reference (zero-padded separable blur) for verification."""
    N, C, H, W = sr.shape
    g = jnp.asarray(_GAUSS)
    x = jnp.pad(sr.reshape(N * C, H, W).astype(jnp.float32),
                ((0, 0), (PAD, PAD), (PAD, PAD)))
    y = jnp.pad(hr.reshape(N * C, H, W).astype(jnp.float32),
                ((0, 0), (PAD, PAD), (PAD, PAD)))

    def blur(z):
        t = sum(g[j] * z[:, :, j:j + W] for j in range(WINDOW_SIZE))
        return sum(g[i] * t[:, i:i + H, :] for i in range(WINDOW_SIZE))

    mu1, mu2 = blur(x), blur(y)
    s1 = blur(x * x) - mu1 * mu1
    s2 = blur(y * y) - mu2 * mu2
    s12 = blur(x * y) - mu1 * mu2
    ssim_map = ((2 * mu1 * mu2 + C1) * (2 * s12 + C2)) / (
        (mu1 * mu1 + mu2 * mu2 + C1) * (s1 + s2 + C2))
    l_ssim = 1.0 - jnp.mean(ssim_map)
    l_mse = jnp.mean((sr.astype(jnp.float32) - hr.astype(jnp.float32)) ** 2)

    mse_w = np.exp(-log_sigma_mse) * MSE_WEIGHT
    ssim_w = np.exp(-log_sigma_ssim) * SSIM_WEIGHT
    if epoch is not None:
        ssim_w = ssim_w * min(1.0 + epoch / 10.0, 3.0)
    return mse_w * l_mse + log_sigma_mse + ssim_w * l_ssim + log_sigma_ssim


if __name__ == "__main__":
    key = jax.random.PRNGKey(0)
    k1, k2 = jax.random.split(key)
    N, C, H, W = 2, 4, 16, 16
    sr = jax.random.uniform(k1, (N, C, H, W), dtype=jnp.float32)
    hr = jax.random.uniform(k2, (N, C, H, W), dtype=jnp.float32)

    # Default tile selection: VMEM-budget-derived, >= 2 grid steps (here
    # tile_nc=4 -> 2-step pipelined, megacore-shardable grid).
    loss = jax.block_until_ready(dynamic_composite_loss(sr, hr))
    ref = jax.block_until_ready(_reference_loss(sr, hr))
    assert np.allclose(np.asarray(loss), np.asarray(ref), rtol=1e-3, atol=1e-3), \
        f"mismatch: kernel={float(loss)} ref={float(ref)}"

    loss_e = jax.block_until_ready(dynamic_composite_loss(sr, hr, epoch=3))
    ref_e = jax.block_until_ready(_reference_loss(sr, hr, epoch=3))
    assert np.allclose(np.asarray(loss_e), np.asarray(ref_e), rtol=1e-3, atol=1e-3), \
        f"mismatch (epoch): kernel={float(loss_e)} ref={float(ref_e)}"

    print("KERNEL_OK")
</pallas_src>

<mosaic_0001>
module attributes {stable_mosaic.version = 11 : i64} {
  func.func @kernel(%arg0: i32, %arg1: memref<256x256xf32, #tpu.memory_space<vmem>>, %arg2: memref<1x4x256xf32, #tpu.memory_space<vmem>>, %arg3: memref<1x4x256xf32, #tpu.memory_space<vmem>>, %arg4: memref<1x8x128xf32, #tpu.memory_space<vmem>>) attributes {dimension_semantics = [#tpu.dimension_semantics<parallel>], iteration_bounds = array<i64: 2>, scalar_prefetch = 0 : i64, scratch_operands = 0 : i64, tpu.core_type = #tpu.core_type<tc>, window_params = [{pipeline_mode = #tpu.pipeline_mode<synchronous>, transform_indices = @transform_0, window_bounds = array<i64: 256, 256>}, {transform_indices = @transform_1, window_bounds = array<i64: 1, 4, 256>}, {transform_indices = @transform_2, window_bounds = array<i64: 1, 4, 256>}, {transform_indices = @transform_3, window_bounds = array<i64: 1, 8, 128>}]} {
    %c0 = arith.constant 0 : index
    %c0_0 = arith.constant 0 : index
    %c0_1 = arith.constant 0 : index
    %0 = vector.load %arg2[%c0, %c0_0, %c0_1] : memref<1x4x256xf32, #tpu.memory_space<vmem>>, vector<1x4x256xf32>
    %1 = vector.shape_cast %0 : vector<1x4x256xf32> to vector<4x256xf32>
    %c0_2 = arith.constant 0 : index
    %c0_3 = arith.constant 0 : index
    %c0_4 = arith.constant 0 : index
    %2 = vector.load %arg3[%c0_2, %c0_3, %c0_4] : memref<1x4x256xf32, #tpu.memory_space<vmem>>, vector<1x4x256xf32>
    %3 = vector.shape_cast %2 : vector<1x4x256xf32> to vector<4x256xf32>
    %4 = arith.subf %1, %3 : vector<4x256xf32>
    %5 = arith.mulf %1, %1 : vector<4x256xf32>
    %6 = arith.mulf %3, %3 : vector<4x256xf32>
    %7 = arith.mulf %1, %3 : vector<4x256xf32>
    %8 = tpu.concatenate %1, %3, %5, %6, %7 in 0 : vector<4x256xf32>, vector<4x256xf32>, vector<4x256xf32>, vector<4x256xf32>, vector<4x256xf32> -> vector<20x256xf32>
    %c0_5 = arith.constant 0 : index
    %c0_6 = arith.constant 0 : index
    %9 = vector.load %arg1[%c0_5, %c0_6] : memref<256x256xf32, #tpu.memory_space<vmem>>, vector<256x256xf32>
    %cst = arith.constant dense<0.000000e+00> : vector<20x256xf32>
    %10 = tpu.matmul %8, %9, %cst {dimension_numbers = #tpu.dot_dimension_numbers<[1], [0], [0], [1], [0, 0, 1, 1], [], []>, precision = #tpu.contract_precision<fp32>} : vector<20x256xf32>, vector<256x256xf32>, vector<20x256xf32> -> vector<20x256xf32>
    %11 = vector.shape_cast %10 : vector<20x256xf32> to vector<5x4x256xf32>
    %12 = vector.extract_strided_slice %11 {offsets = [0, 0, 0], sizes = [1, 4, 256], strides = [1, 1, 1]} : vector<5x4x256xf32> to vector<1x4x256xf32>
    %13 = vector.shape_cast %12 : vector<1x4x256xf32> to vector<4x256xf32>
    %14 = vector.extract_strided_slice %11 {offsets = [1, 0, 0], sizes = [1, 4, 256], strides = [1, 1, 1]} : vector<5x4x256xf32> to vector<1x4x256xf32>
    %15 = vector.shape_cast %14 : vector<1x4x256xf32> to vector<4x256xf32>
    %16 = vector.extract_strided_slice %11 {offsets = [2, 0, 0], sizes = [1, 4, 256], strides = [1, 1, 1]} : vector<5x4x256xf32> to vector<1x4x256xf32>
    %17 = vector.shape_cast %16 : vector<1x4x256xf32> to vector<4x256xf32>
    %18 = vector.extract_strided_slice %11 {offsets = [3, 0, 0], sizes = [1, 4, 256], strides = [1, 1, 1]} : vector<5x4x256xf32> to vector<1x4x256xf32>
    %19 = vector.shape_cast %18 : vector<1x4x256xf32> to vector<4x256xf32>
    %20 = vector.extract_strided_slice %11 {offsets = [4, 0, 0], sizes = [1, 4, 256], strides = [1, 1, 1]} : vector<5x4x256xf32> to vector<1x4x256xf32>
    %21 = vector.shape_cast %20 : vector<1x4x256xf32> to vector<4x256xf32>
    %22 = arith.mulf %13, %13 : vector<4x256xf32>
    %23 = arith.mulf %15, %15 : vector<4x256xf32>
    %24 = arith.mulf %13, %15 : vector<4x256xf32>
    %25 = arith.subf %17, %22 : vector<4x256xf32>
    %26 = arith.subf %19, %23 : vector<4x256xf32>
    %27 = arith.subf %21, %24 : vector<4x256xf32>
    %cst_7 = arith.constant 2.000000e+00 : f32
    %28 = vector.broadcast %cst_7 : f32 to vector<4x256xf32>
    %29 = arith.mulf %28, %24 : vector<4x256xf32>
    %cst_8 = arith.constant 9.99999974E-5 : f32
    %30 = vector.broadcast %cst_8 : f32 to vector<4x256xf32>
    %31 = arith.addf %29, %30 : vector<4x256xf32>
    %cst_9 = arith.constant 2.000000e+00 : f32
    %32 = vector.broadcast %cst_9 : f32 to vector<4x256xf32>
    %33 = arith.mulf %32, %27 : vector<4x256xf32>
    %cst_10 = arith.constant 8.99999984E-4 : f32
    %34 = vector.broadcast %cst_10 : f32 to vector<4x256xf32>
    %35 = arith.addf %33, %34 : vector<4x256xf32>
    %36 = arith.mulf %31, %35 : vector<4x256xf32>
    %37 = arith.addf %22, %23 : vector<4x256xf32>
    %cst_11 = arith.constant 9.99999974E-5 : f32
    %38 = vector.broadcast %cst_11 : f32 to vector<4x256xf32>
    %39 = arith.addf %37, %38 : vector<4x256xf32>
    %40 = arith.addf %25, %26 : vector<4x256xf32>
    %cst_12 = arith.constant 8.99999984E-4 : f32
    %41 = vector.broadcast %cst_12 : f32 to vector<4x256xf32>
    %42 = arith.addf %40, %41 : vector<4x256xf32>
    %43 = arith.mulf %39, %42 : vector<4x256xf32>
    %44 = arith.divf %36, %43 : vector<4x256xf32>
    %c4_i32 = arith.constant 4 : i32
    %45 = arith.muli %arg0, %c4_i32 : i32
    %46 = tpu.iota {dimensions = array<i32: 0>} : vector<4x1xi32>
    %47 = vector.broadcast %45 : i32 to vector<4x1xi32>
    %48 = arith.addi %47, %46 : vector<4x1xi32>
    %c8_i32 = arith.constant 8 : i32
    %49 = vector.broadcast %c8_i32 : i32 to vector<4x1xi32>
    %50 = arith.cmpi slt, %48, %49 : vector<4x1xi32>
    %51 = arith.extui %50 : vector<4x1xi1> to vector<4x1xi32>
    %52 = arith.sitofp %51 : vector<4x1xi32> to vector<4x1xf32>
    %53 = vector.broadcast %52 : vector<4x1xf32> to vector<4x256xf32>
    %54 = arith.mulf %44, %53 : vector<4x256xf32>
    %cst_13 = arith.constant dense<0.000000e+00> : vector<256xf32>
    %55 = vector.multi_reduction <add>, %54, %cst_13 [0] : vector<4x256xf32> to vector<256xf32>
    %56 = vector.shape_cast %55 : vector<256xf32> to vector<2x128xf32>
    %57 = arith.mulf %4, %4 : vector<4x256xf32>
    %58 = vector.broadcast %52 : vector<4x1xf32> to vector<4x256xf32>
    %59 = arith.mulf %57, %58 : vector<4x256xf32>
    %cst_14 = arith.constant dense<0.000000e+00> : vector<256xf32>
    %60 = vector.multi_reduction <add>, %59, %cst_14 [0] : vector<4x256xf32> to vector<256xf32>
    %61 = vector.shape_cast %60 : vector<256xf32> to vector<2x128xf32>
    %cst_15 = arith.constant 0.000000e+00 : f32
    %62 = vector.broadcast %cst_15 : f32 to vector<4x128xf32>
    %63 = tpu.concatenate %56, %61, %62 in 0 : vector<2x128xf32>, vector<2x128xf32>, vector<4x128xf32> -> vector<8x128xf32>
    %64 = vector.shape_cast %63 : vector<8x128xf32> to vector<1x8x128xf32>
    %c0_16 = arith.constant 0 : index
    %c0_17 = arith.constant 0 : index
    %c0_18 = arith.constant 0 : index
    %65 = vector.load %arg4[%c0_16, %c0_17, %c0_18] : memref<1x8x128xf32, #tpu.memory_space<vmem>>, vector<1x8x128xf32>
    tpu.vector_store %arg4[%c0_16, %c0_17, %c0_18], %64 {strides = array<i32>} : memref<1x8x128xf32, #tpu.memory_space<vmem>>, vector<1x8x128xf32>,
    return
  }
  func.func @transform_0(%arg0: i32) -> (i32, i32) {
    %c0_i32 = arith.constant 0 : i32
    %c0_i32_0 = arith.constant 0 : i32
    %c0_i32_1 = arith.constant 0 : i32
    return %c0_i32, %c0_i32_0 : i32, i32
  }
  func.func @transform_1(%arg0: i32) -> (i32, i32, i32) {
    %c0_i32 = arith.constant 0 : i32
    %c0_i32_0 = arith.constant 0 : i32
    %c0_i32_1 = arith.constant 0 : i32
    return %arg0, %c0_i32, %c0_i32_0 : i32, i32, i32
  }
  func.func @transform_2(%arg0: i32) -> (i32, i32, i32) {
    %c0_i32 = arith.constant 0 : i32
    %c0_i32_0 = arith.constant 0 : i32
    %c0_i32_1 = arith.constant 0 : i32
    return %arg0, %c0_i32, %c0_i32_0 : i32, i32, i32
  }
  func.func @transform_3(%arg0: i32) -> (i32, i32, i32) {
    %c0_i32 = arith.constant 0 : i32
    %c0_i32_0 = arith.constant 0 : i32
    %c0_i32_1 = arith.constant 0 : i32
    return %arg0, %c0_i32, %c0_i32_0 : i32, i32, i32
  }
}

</mosaic_0001>

<bundles_post_ra>
// kernel: tpu_custom_call.1
= control target key start
LH: loop header
LB: loop body
LE: loop exit
PB: predicated region body
PF: predicated region fallthrough
CT: control target
= control target key end

     0   :  { %8 = vsyncpa [#allocation3], 0  ;;  %s3784_s0 = inlined_call_operand.hbm [shape: f32[256,256], index: 0, kind: input, shape index: {}]   ;;  %s3785_s1 = inlined_call_operand.hbm [shape: f32[2,4,256], index: 1, kind: input, shape index: {}]   ;;  %s3786_s2 = inlined_call_operand.hbm [shape: f32[2,4,256], index: 2, kind: input, shape index: {}]   ;;  %s3787_s3 = inlined_call_operand.hbm [shape: f32[2,8,128], index: 3, kind: output, shape index: {}]  }
   0x1   :  { %9 = vsyncpa [#allocation6], 0 }
   0x2   :  { %11 = vsyncpa [#allocation6 + $0x1], 0 }
   0x3   :  { %12 = vsyncpa [#allocation4], 0 }
   0x4   :  { %14 = vsyncpa [#allocation4 + $0x1], 0  ;;  %s2257_s12 = smov 0   ;;  %s2259_s13 = smov 0  }
   0x5   :  { %s2261_s14 = smov 0   ;;  %s2263_s15 = smov 0  }
   0x6 LB: > { %s2278_s16 = sadd.s32 1, %s2226_s15   ;;  %s48_s17 = sadd.s32 1, %s2222_s14  ;;  %s2226_s15 = sphi %s2263_s15, %s4395_s15   ;;  %s2222_s14 = sphi %s2261_s14, %s4394_s14   ;;  %s2218_s13 = sphi %s2259_s13, %s4393_s13   ;;  %s2214_s12 = sphi %s2257_s12, %s4392_s12  }
   0x7   : > { %s45_s18 = ssub.s32 %s2226_s15, %s2278_s16  ;;  %p3788_p0 = scmp.ne.s32.totalorder %s2222_s14, %s2218_s13 }
   0x8   : > { %p46_p1 = scmp.eq.s32.totalorder %s45_s18, 0  ;;  %p56_p2 = scmp.eq.s32.totalorder %s2226_s15, 0 }
   0x9   : > { %p2031_p4 = scmp.lt.s32.totalorder %s2226_s15, 2  ;;  %s150_s20 = sand.u32 1, %s2226_s15  }
   0xa   : > { %s2289_s19 = scalar_select %p46_p1, %s2222_s14, %s48_s17  }
   0xb   : > { %p57_p5 = por %p56_p2, %p3788_p0  ;;  %s152_s21 = sand.u32 1, %s2222_s14  }
   0xc   : > { %s2296_s22 = sshll.u32 %s152_s21, 3  ;;  %s2003_s23 = sshll.u32 %s2226_s15, 7 }
   0xd   : > { %s2304_s26 = scalar_lea.hbm %s3785_s1, %s2003_s23  ;;  %s154_s27 = scalar_lea.vmem [#allocation5], %s2296_s22 }
   0xe   : > { %s162_s28 = sshll.u32 %s154_s27, 4  ;;  %p2307_p6 = pnand %p2031_p4, %p57_p5  ;;  %s163_s28 = int_to_ptr.vmem [resolvable:$true] %s162_s28 }
   0xf   : > { %s2311_s30 = scalar_lea.sflag [#allocation6], %s150_s20  ;;  %s2076_s4 = scalar_lea.hbm %s2304_s26, 128 }
  0x10   : > { %p2077_p7 = scmp.ne.s32.totalorder %s2304_s26, %s2076_s4  ;;  %p2078_p8 = pneg %p2307_p6 }
  0x11   : > { %s2081_s7 = scalar_lea.hbm %s3785_s1, 256  ;;  %p2082_p11 = scmp.lt.s32.totalorder %s2304_s26, %s3785_s1 }
  0x12   : > { %p2079_p9 = pnand %p2078_p8, %p2077_p7  ;;  %p2083_p12 = scmp.lt.s32.totalorder %s2081_s7, %s2076_s4 }
  0x14   : > { %p2080_p10 = pneg %p2079_p9  ;;  %p2084_p13 = por %p2083_p12, %p2082_p11 }
  0x16   : > { %p2085_p1 = pnand %p2084_p13, %p2080_p10 }
  0x18   : > { %2088 = shalt.err (!%p2085_p1)
}
  0x19   : > { %s2089_s10 = scalar_lea.vmem %s163_s28, 128  ;;  %s2228_s11 = smov [#allocation5]  }
  0x1a   : > { %p2090_p2 = scmp.ne.s32.totalorder %s163_s28, %s2089_s10  ;;  %s2094_s17 = sshll.u32 %s2228_s11, 4  ;;  %s2095_s17 = int_to_ptr.vmem [resolvable:$false] %s2094_s17 }
  0x1b   : > { %s2096_s18 = scalar_lea.vmem %s2095_s17, 256  ;;  %p2097_p7 = scmp.lt.s32.totalorder %s163_s28, %s2095_s17 }
  0x1c   : > { %p2092_p4 = pnand %p2090_p2, %p2078_p8  ;;  %p2098_p9 = scmp.lt.s32.totalorder %s2096_s18, %s2089_s10 }
  0x1e   : > { %p2093_p5 = pneg %p2092_p4  ;;  %p2099_p3 = por %p2098_p9, %p2097_p7 }
  0x20   : > { %p2100_p0 = pnand %p2099_p3, %p2093_p5 }
  0x22   : > { %2103 = shalt.err (!%p2100_p0)
}
  0x23   : > { %2022 = dma.hbm_to_vmem [thread:$0]  (!%p2307_p6), %s2304_s26, 128, %s163_s28, %s2311_s30  }
  0x24   : > { %s2335_s20 = sadd.s32 4294967295, %s2226_s15   ;;  %s1982_s21 = sadd.s32 4294967294, %s2226_s15  }
  0x25   : > { %p61_p0 = scmp.ne.s32.totalorder %s2218_s13, %s2214_s12  ;;  %p3789_p3 = scmp.eq.s32.totalorder %s2335_s20, 0 }
  0x26   : > { %p111_p10 = scmp.eq.s32.totalorder %s2335_s20, 1  ;;  %p117_p11 = scmp.eq.s32.totalorder %s1982_s21, 1 }
  0x27   : > { %p2344_p12 = por %p3789_p3, %p61_p0  ;;  %p1983_p13 = scmp.ge.s32.totalorder %s2226_s15, 1 }
  0x28   : > { %p4013_p1 = scmp.ne.s32.totalorder %s2222_s14, %s2218_s13  ;;  %p2356_p4 = por %p117_p11, %p61_p0 }
  0x29   : > { %s4012_s24 = scalar_select %p2344_p12, 1, 0 }
  0x2a   : > { %p2352_p2 = por %p111_p10, %p4013_p1  ;;  %p124_p5 = scmp.lt.s32.totalorder %s2226_s15, 3 }
  0x2b   : > { %s4015_s26 = scalar_select %p2356_p4, 1, 0 }
  0x2c   : > { %s4014_s25 = scalar_select %p2352_p2, 1, 0 }
  0x2d   : > { %p2361_p7 = pnand %p1983_p13, %p124_p5  ;;  %s2229_s28 = smov [#allocation2]  }
  0x2e   : > { %s136_s4 = sshll.u32 %s2229_s28, 4  ;;  %s2370_s7 = scalar_lea.hbm %s3786_s2, %s2003_s23  ;;  %s2375_s4 = int_to_ptr.vmem [resolvable:$true] %s136_s4 }
  0x2f   : > { %s4016_s27 = scalar_select %p2361_p7, 1, 0 }
  0x30   : > { %p2015_p9 = pneg %p2361_p7  ;;  %s173_s8 = scalar_lea.vmem [#allocation7], %s2296_s22 }
  0x31   : > { %s181_s9 = sshll.u32 %s173_s8, 4  ;;  %s2104_s11 = scalar_lea.hbm %s2370_s7, 128  ;;  %s182_s9 = int_to_ptr.vmem [resolvable:$true] %s181_s9 }
  0x32   : > { %p2379_p0 = pnand %p2015_p9, %p3789_p3  ;;  %p2105_p10 = scmp.ne.s32.totalorder %s2370_s7, %s2104_s11 }
  0x33   : > { %s2109_s18 = scalar_lea.hbm %s3786_s2, 256  ;;  %p2110_p1 = scmp.lt.s32.totalorder %s2370_s7, %s3786_s2 }
  0x34   : > { %s4017_s10 = scalar_select %p2379_p0, 1, 0 }
  0x35   : > { %p2107_p11 = pnand %p2105_p10, %p2078_p8  ;;  %p2111_p5 = scmp.lt.s32.totalorder %s2109_s18, %s2104_s11 }
  0x37   : > { %p2108_p13 = pneg %p2107_p11  ;;  %p2112_p4 = por %p2111_p5, %p2110_p1 }
  0x39   : > { %p2113_p9 = pnand %p2112_p4, %p2108_p13 }
  0x3b   : > { %2116 = shalt.err (!%p2113_p9)
}
  0x3c   : > { %s2117_s28 = scalar_lea.vmem %s182_s9, 128  ;;  %s2230_s5 = smov [#allocation7]  }
  0x3d   : > { %p2118_p3 = scmp.ne.s32.totalorder %s182_s9, %s2117_s28  ;;  %s2122_s6 = sshll.u32 %s2230_s5, 4  ;;  %s2123_s6 = int_to_ptr.vmem [resolvable:$false] %s2122_s6 }
  0x3e   : > { %s2124_s8 = scalar_lea.vmem %s2123_s6, 256  ;;  %p2125_p11 = scmp.lt.s32.totalorder %s182_s9, %s2123_s6 }
  0x3f   : > { %p2120_p2 = pnand %p2118_p3, %p2078_p8  ;;  %p2126_p12 = scmp.lt.s32.totalorder %s2124_s8, %s2117_s28 }
  0x41   : > { %p2121_p10 = pneg %p2120_p2  ;;  %p2127_p7 = por %p2126_p12, %p2125_p11 }
  0x43   : > { %p2128_p0 = pnand %p2127_p7, %p2121_p10 }
  0x45   : > { %2131 = shalt.err (!%p2128_p0)
}
  0x46   : > { %2025 = dma.hbm_to_vmem [thread:$0]  (!%p2307_p6), %s2370_s7, 128, %s182_s9, %s2311_s30  }
  0x47   : > { %p4018_p8 = scmp.ne.s32.totalorder %s4017_s10, 0  ;;  %s2143_s11 = scalar_lea.vmem %s2375_s4, 8192 }
  0x48   : > { %p2144_p2 = scmp.ne.s32.totalorder %s2375_s4, %s2143_s11  ;;  %p2151_p1 = scmp.lt.s32.totalorder %s2375_s4, %s2375_s4 }
  0x49   : > { %p2134_p3 = pneg %p4018_p8  ;;  %p2152_p12 = scmp.lt.s32.totalorder %s2143_s11, %s2143_s11 }
  0x4b   : > { %p2146_p4 = pnand %p2144_p2, %p2134_p3  ;;  %p2153_p7 = por %p2152_p12, %p2151_p1 }
  0x4d   : > { %p2147_p13 = pneg %p2146_p4 }
  0x4f   : > { %p2154_p0 = pnand %p2153_p7, %p2147_p13 }
  0x51   : > { %2157 = shalt.err (!%p2154_p0)
}
  0x52   : > { %s2231_s29 = smov 256   ;;  %s2232_s23 = smov 16  }
  0x53   : > { %2018 = dma.hbm_to_vmem [thread:$0]  (!%p4018_p8), %s3784_s0, 8192, %s2375_s4, [#allocation3], %s2231_s29, %s2231_s29, %s2232_s23  }
  0x54   : > { %p4019_p6 = scmp.ne.s32.totalorder %s4016_s27, 0 }
  0x56   : > { %190 = sbr.rel (%p4019_p6) target bundleno = 600 (0x258), region = 32 }
  0x5b   : > { %p4020_p5 = scmp.eq.s32.totalorder %s2335_s20, 0 }
  0x5d   : > { %2201 = dma.done.wait (%p4020_p5), [#allocation3], 8192   ;;  %p4021_p9 = pmov %p4020_p5 }
  0x5e   : > { %s196_s30 = sand.u32 1, %s2335_s20   ;;  %s198_s7 = sand.u32 1, %s2218_s13  }
  0x5f   : > { %2203 = vsyncadd (%p4021_p9), [#allocation3], 4294959104  ;;  %s2424_s9 = sshll.u32 %s198_s7, 3  ;;  %s197_s4 = scalar_lea.sflag [#allocation6], %s196_s30 }
  0x60   : > { %s200_s10 = scalar_lea.vmem [#allocation5], %s2424_s9  ;;  %p4022_p10 = scmp.ne.s32.totalorder %s4012_s24, 0 }
  0x62   : > { %2205 = dma.done.wait (%p4022_p10), %s197_s4, 256  }
  0x63   : > { %2207 = vsyncadd (%p4022_p10), %s197_s4, 4294967040  ;;  %v294_v0 = vld [vmem:[#allocation2 + $0xf8] sm:$0xff]  ;;  %v293_v1 = vld [vmem:[#allocation2 + $0xf0] sm:$0xff]  ;;  %vm258_vm0 = vcmask 1043456   ;;  %s209_s24 = scalar_lea.vmem [#allocation7], %s2424_s9  ;;  %s1997_s27 = sshll.u32 %s2335_s20, 2 }
  0x64   : > { %v292_v2 = vld [vmem:[#allocation2 + $0xe8] sm:$0xff]  ;;  %v2431_v3 = vand.u32 4294901760, %v294_v0  ;;  %v2433_v4 = vand.u32 4294901760, %v293_v1  ;;  %v291_v6 = vld [vmem:[#allocation2 + $0xe0] sm:$0xff]  ;;  %v290_v7 = vld [vmem:[#allocation2 + $0xd8] sm:$0xff]  ;;  %vm1862_vm2 = vcmask 1041408  }
  0x65   : > { %v2435_v5 = vand.u32 4294901760, %v292_v2  ;;  %v289_v8 = vld [vmem:[#allocation2 + $0xd0] sm:$0xff]  ;;  %v2437_v9 = vand.u32 4294901760, %v291_v6  ;;  %v2439_v10 = vand.u32 4294901760, %v290_v7  ;;  %v288_v12 = vld [vmem:[#allocation2 + $0xc8] sm:$0xff]  ;;  %v287_v13 = vld [vmem:[#allocation2 + $0xc0] sm:$0xff] }
  0x66   : > { %v2441_v11 = vand.u32 4294901760, %v289_v8  ;;  %v286_v14 = vld [vmem:[#allocation2 + $0xb8] sm:$0xff]  ;;  %328 = vmatprep.subr.mxu0 %v2431_v3  ;;  %v2444_v15 = vand.u32 4294901760, %v288_v12  ;;  %v2446_v16 = vand.u32 4294901760, %v287_v13  ;;  %v2451_v18 = vsub.f32 %v294_v0, %v2431_v3  ;;  %v2453_v19 = vld [vmem:[#allocation2 + $0xb0] sm:$0xff]  ;;  %v2455_v20 = vld [vmem:[#allocation2 + $0xa8] sm:$0xff] }
  0x67   : > { %v2448_v17 = vand.u32 4294901760, %v286_v14  ;;  %v2457_v21 = vld [vmem:[#allocation2 + $0xa0] sm:$0xff]  ;;  %330 = vmatpush1.msra.mxu0 %v2433_v4  ;;  %v2461_v22 = vand.u32 4294901760, %v2453_v19  ;;  %v2464_v23 = vsub.f32 %v293_v1, %v2433_v4  ;;  %v2467_v24 = vand.u32 4294901760, %v2455_v20  ;;  %v2472_v26 = vld [vmem:[#allocation2 + $0x98] sm:$0xff]  ;;  %v2474_v27 = vld [vmem:[#allocation2 + $0x90] sm:$0xff] }
  0x68   : > { %4023 = vst [vmem:[#allocation12_spill] sm:$0xff] %v2451_v18  ;;  %v2470_v25 = vsub.f32 %v292_v2, %v2435_v5  ;;  %v2476_v28 = vld [vmem:[#allocation2 + $0x88] sm:$0xff]  ;;  %332 = vmatprep.subr.mxu0 %v2435_v5  ;;  %v3807_v29 = vand.u32 4294901760, %v2451_v18  ;;  %v2481_v30 = vand.u32 4294901760, %v2457_v21  ;;  %v2484_v31 = vsub.f32 %v291_v6, %v2437_v9  ;;  %v2498_v37 = vld [vmem:[#allocation2 + $0x80] sm:$0xff]  ;;  %v2522_v46 = vld [vmem:[#allocation2 + $0x78] sm:$0xff] }
  0x69   : > { %4024 = vst [vmem:[#allocation13_spill] sm:$0xff] %v2467_v24  ;;  %v2487_v32 = vand.u32 4294901760, %v2472_v26  ;;  %334 = vmatpush1.msra.mxu0 %v2437_v9  ;;  %v3805_v33 = vand.u32 4294901760, %v2464_v23  ;;  %v2493_v35 = vsub.f32 %v290_v7, %v2439_v10  ;;  %v2496_v36 = vand.u32 4294901760, %v2474_v27  ;;  %v2532_v51 = vld [vmem:[#allocation2 + $0x70] sm:$0xff]  ;;  %v2539_v56 = vld [vmem:[#allocation2 + $0x68] sm:$0xff] }
  0x6a   : > { %4025 = vst [vmem:[#allocation14_spill] sm:$0xff] %v2481_v30  ;;  %v3804_v34 = vand.u32 4294901760, %v2470_v25  ;;  %336 = vmatprep.subr.mxu0 %v2439_v10  ;;  %v507_v38 = vsub.f32 %v2451_v18, %v3807_v29  ;;  %v3802_v39 = vand.u32 4294901760, %v2484_v31  ;;  %v2506_v40 = vsub.f32 %v289_v8, %v2441_v11  ;;  %v2551_v61 = vld [vmem:[#allocation2 + $0x60] sm:$0xff]  ;;  %v2563_v2 = vld [vmem:[#allocation2 + $0x58] sm:$0xff]  ;;  %s2000_s22 = sshll.u32 %s2335_s20, 7 }
  0x6b   : > { %4026 = vst [vmem:[#allocation15_spill] sm:$0xff] %v2487_v32  ;;  %4027 = vst [vmem:[#allocation16_spill] sm:$0xff] %v2496_v36  ;;  %v2509_v41 = vand.u32 4294901760, %v2476_v28  ;;  %338 = vmatpush1.msra.mxu0 %v2441_v11  ;;  %v513_v42 = vsub.f32 %v2464_v23, %v3805_v33  ;;  %v3800_v44 = vand.u32 4294901760, %v2493_v35  ;;  %v2520_v45 = vsub.f32 %v288_v12, %v2444_v15  ;;  %s236_s21 = scalar_lea.vmem [#allocation8], %s2424_s9  ;;  %s3745_s8 = scalar_lea.hbm %s3787_s3, %s2000_s22 }
  0x6c   : > { %v519_v43 = vsub.f32 %v2470_v25, %v3804_v34  ;;  %340 = vmatprep.subr.mxu0 %v2444_v15  ;;  %v508_v47 = vand.u32 4294901760, %v507_v38  ;;  %v525_v48 = vsub.f32 %v2484_v31, %v3802_v39  ;;  %v3799_v49 = vand.u32 4294901760, %v2506_v40  ;;  %v2654_v39 = vld [vmem:[#allocation2 + $0x28] sm:$0xff]  ;;  %v2664_v34 = vld [vmem:[#allocation2 + $0x20] sm:$0xff]  ;;  %s1880_s28 = sshll.u32 %s236_s21, 4  ;;  %s1867_s11 = scalar_lea.sflag [#allocation4], %s198_s7  ;;  %s1881_s28 = int_to_ptr.vmem [resolvable:$true] %s1880_s28 }
  0x6d   : > { %4028 = vst [vmem:[#allocation17_spill] sm:$0xff] %v2509_v41  ;;  %v2530_v50 = vand.u32 4294901760, %v2498_v37  ;;  %342 = vmatpush1.msra.mxu0 %v2446_v16  ;;  %v514_v52 = vand.u32 4294901760, %v513_v42  ;;  %v531_v54 = vsub.f32 %v2493_v35, %v3800_v44  ;;  %v3797_v55 = vand.u32 4294901760, %v2520_v45  ;;  %s2158_s29 = scalar_lea.vmem %s1881_s28, 128  ;;  %p4389_p8 = scmp.ne.s32.totalorder %s4014_s25, 0 }
  0x6e   : > { %v520_v53 = vand.u32 4294901760, %v519_v43  ;;  %344 = vmatprep.subr.mxu0 %v2448_v17  ;;  %509 = vmatprep.subr.mxu1 %v508_v47  ;;  %v526_v57 = vand.u32 4294901760, %v525_v48  ;;  %v537_v58 = vsub.f32 %v2506_v40, %v3799_v49  ;;  %v2546_v59 = vsub.f32 %v287_v13, %v2446_v16  ;;  %v2574_v13 = vld [vmem:[#allocation2 + $0x50] sm:$0xff]  ;;  %p2159_p11 = scmp.ne.s32.totalorder %s1881_s28, %s2158_s29  ;;  %s2236_s20 = smov [#allocation8]  }
  0x6f   : > { %4029 = vst [vmem:[#allocation18_spill] sm:$0xff] %v2530_v50  ;;  %v2549_v60 = vand.u32 4294901760, %v2522_v46  ;;  %346 = vmatpush1.msra.mxu0 %v2461_v22  ;;  %515 = vmatpush1.msra.mxu1 %v514_v52  ;;  %v532_v62 = vand.u32 4294901760, %v531_v54  ;;  %v543_v63 = vsub.f32 %v2520_v45, %v3797_v55  ;;  %v2558_v0 = vsub.f32 %v286_v14, %v2448_v17  ;;  %v2641_v49 = vld [vmem:[#allocation2 + $0x30] sm:$0xff]  ;;  %s2162_s23 = sshll.u32 %s2236_s20, 4  ;;  %s2163_s23 = int_to_ptr.vmem [resolvable:$false] %s2162_s23 }
  0x70   : > { %v2561_v1 = vand.u32 4294901760, %v2532_v51  ;;  %348 = vmatprep.subr.mxu0 %v2467_v24  ;;  %521 = vmatprep.subr.mxu1 %v520_v53  ;;  %v538_v6 = vand.u32 4294901760, %v537_v58  ;;  %v3795_v7 = vand.u32 4294901760, %v2546_v59  ;;  %v2569_v8 = vsub.f32 %v2453_v19, %v2461_v22  ;;  %p2160_p3 = pnand %p2159_p11, %p4389_p8  ;;  %s2164_s17 = scalar_lea.vmem %s2163_s23, 256 }
  0x71   : > { %4030 = vst [vmem:[#allocation19_spill] sm:$0xff] %v2549_v60  ;;  %v2572_v12 = vand.u32 4294901760, %v2539_v56  ;;  %350 = vmatpush1.msra.mxu0 %v2481_v30  ;;  %527 = vmatpush1.msra.mxu1 %v526_v57  ;;  %v544_v14 = vand.u32 4294901760, %v543_v63  ;;  %v3794_v38 = vand.u32 4294901760, %v2558_v0  ;;  %v2580_v42 = vsub.f32 %v2455_v20, %v2467_v24  ;;  %v2597_v20 = vld [vmem:[#allocation2 + $0x48] sm:$0xff]  ;;  %p2165_p4 = scmp.lt.s32.totalorder %s1881_s28, %s2163_s23  ;;  %p2166_p13 = scmp.lt.s32.totalorder %s2164_s17, %s2158_s29 }
  0x72   : > { %4031 = vst [vmem:[#allocation20_spill] sm:$0xff] %v2561_v1  ;;  %v2583_v43 = vand.u32 4294901760, %v2551_v61  ;;  %352 = vmatprep.subr.mxu0 %v2487_v32  ;;  %533 = vmatprep.subr.mxu1 %v532_v62  ;;  %v549_v19 = vsub.f32 %v2546_v59, %v3795_v7  ;;  %v3796_v47 = vand.u32 4294901760, %v2569_v8  ;;  %v2592_v48 = vsub.f32 %v2457_v21, %v2481_v30  ;;  %p2161_p2 = pneg %p2160_p3 }
  0x73   : > { %4032 = vst [vmem:[#allocation21_spill] sm:$0xff] %v2572_v12  ;;  %v2595_v52 = vand.u32 4294901760, %v2563_v2  ;;  %354 = vmatpush1.msra.mxu0 %v2496_v36  ;;  %539 = vmatpush1.msra.mxu1 %v538_v6  ;;  %v555_v53 = vsub.f32 %v2558_v0, %v3794_v38  ;;  %v3798_v54 = vand.u32 4294901760, %v2580_v42  ;;  %v2606_v57 = vsub.f32 %v2472_v26, %v2487_v32  ;;  %v2620_v38 = vld [vmem:[#allocation2 + $0x40] sm:$0xff]  ;;  %p2167_p1 = por %p2166_p13, %p2165_p4 }
  0x74   : > { %4033 = vst [vmem:[#allocation22_spill] sm:$0xff] %v2583_v43  ;;  %v2609_v21 = vand.u32 4294901760, %v2574_v13  ;;  %356 = vmatprep.subr.mxu0 %v2509_v41  ;;  %545 = vmatprep.subr.mxu1 %v544_v14  ;;  %v550_v58 = vand.u32 4294901760, %v549_v19  ;;  %v561_v62 = vsub.f32 %v2569_v8, %v3796_v47  ;;  %v3801_v63 = vand.u32 4294901760, %v2592_v48  ;;  %v2630_v47 = vld [vmem:[#allocation2 + $0x38] sm:$0xff] }
  0x75   : > { %4034 = vst [vmem:[#allocation23_spill] sm:$0xff] %v2595_v52  ;;  %v2618_v6 = vsub.f32 %v2474_v27, %v2496_v36  ;;  %358 = vmatpush1.msra.mxu0 %v2530_v50  ;;  %v556_v26 = vand.u32 4294901760, %v555_v53  ;;  %v567_v14 = vsub.f32 %v2580_v42, %v3798_v54  ;;  %v3803_v19 = vand.u32 4294901760, %v2606_v57  ;;  %v2744_v36 = vld [vmem:[#allocation2 + $0x1f8] sm:$0xff]  ;;  %p2168_p12 = pnand %p2167_p1, %p2161_p2 }
  0x76   : > { %4035 = vst [vmem:[#allocation24_spill] sm:$0xff] %v2609_v21  ;;  %v2628_v7 = vand.u32 4294901760, %v2597_v20  ;;  %551 = vmatpush1.msra.mxu1 %v550_v58  ;;  %360 = vmatprep.subr.mxu0 %v2549_v60  ;;  %v562_v27 = vand.u32 4294901760, %v561_v62  ;;  %v573_v55 = vsub.f32 %v2592_v48, %v3801_v63  ;;  %v2639_v54 = vsub.f32 %v2476_v28, %v2509_v41 }
  0x77   : > { %v3806_v53 = vand.u32 4294901760, %v2618_v6  ;;  %557 = vmatprep.subr.mxu1 %v556_v26  ;;  %362 = vmatpush1.msra.mxu0 %v2561_v1  ;;  %v568_v44 = vand.u32 4294901760, %v567_v14  ;;  %v579_v58 = vsub.f32 %v2606_v57, %v3803_v19  ;;  %v2648_v62 = vand.u32 4294901760, %v2620_v38 }
  0x78   : > { %4036 = vst [vmem:[#allocation25_spill] sm:$0xff] %v2628_v7  ;;  %v2652_v63 = vsub.f32 %v2498_v37, %v2530_v50  ;;  %563 = vmatpush1.msra.mxu1 %v562_v27  ;;  %364 = vmatprep.subr.mxu0 %v2572_v12  ;;  %v574_v28 = vand.u32 4294901760, %v573_v55  ;;  %v3810_v14 = vand.u32 4294901760, %v2639_v54  ;;  %v2662_v19 = vand.u32 4294901760, %v2630_v47 }
  0x79   : > { %4037 = vst [vmem:[#allocation26_spill] sm:$0xff] %v2648_v62  ;;  %v585_v26 = vsub.f32 %v2618_v6, %v3806_v53  ;;  %569 = vmatprep.subr.mxu1 %v568_v44  ;;  %366 = vmatpush1.msra.mxu0 %v2583_v43  ;;  %v580_v37 = vand.u32 4294901760, %v579_v58  ;;  %v2670_v55 = vsub.f32 %v2522_v46, %v2549_v60  ;;  %v2673_v33 = vand.u32 4294901760, %v2641_v49  ;;  %v2675_v53 = vld [vmem:[#allocation2 + $0x18] sm:$0xff] }
  0x7a   : > { %4038 = vst [vmem:[#allocation27_spill] sm:$0xff] %v2662_v19  ;;  %v3813_v27 = vand.u32 4294901760, %v2652_v63  ;;  %575 = vmatpush1.msra.mxu1 %v574_v28  ;;  %368 = vmatprep.subr.mxu0 %v2595_v52  ;;  %v591_v44 = vsub.f32 %v2639_v54, %v3810_v14  ;;  %v2683_v58 = vsub.f32 %v2532_v51, %v2561_v1  ;;  %v2686_v46 = vand.u32 4294901760, %v2654_v39  ;;  %v2700_v51 = vld [vmem:[#allocation2 + $0x10] sm:$0xff] }
  0x7b   : > { %4039 = vst [vmem:[#allocation28_spill] sm:$0xff] %v2673_v33  ;;  %v586_v29 = vand.u32 4294901760, %v585_v26  ;;  %581 = vmatprep.subr.mxu1 %v580_v37  ;;  %370 = vmatpush1.msra.mxu0 %v2609_v21  ;;  %v2695_v60 = vsub.f32 %v2539_v56, %v2572_v12  ;;  %v2698_v14 = vand.u32 4294901760, %v2664_v34  ;;  %v2709_v26 = vand.u32 4294901760, %v2675_v53  ;;  %v2711_v56 = vld [vmem:[#allocation2 + $0x8] sm:$0xff] }
  0x7c   : > { %4040 = vst [vmem:[#allocation29_spill] sm:$0xff] %v2686_v46  ;;  %v597_v28 = vsub.f32 %v2652_v63, %v3813_v27  ;;  %372 = vmatprep.subr.mxu0 %v2628_v7  ;;  %v592_v37 = vand.u32 4294901760, %v591_v44  ;;  %v2706_v27 = vsub.f32 %v2551_v61, %v2583_v43  ;;  %v4045_v50 = vand.u32 4294901760, %v2670_v55  ;;  %v2734_v44 = vld [vmem:[#allocation2] sm:$0xff] }
  0x7d   : > { %4041 = vst [vmem:[#allocation30_spill] sm:$0xff] %v2695_v60  ;;  %4042 = vst [vmem:[#allocation31_spill] sm:$0xff] %v2698_v14  ;;  %587 = vmatpush1.msra.mxu1 %v586_v29  ;;  %374 = vmatpush1.msra.mxu0 %v2648_v62  ;;  %v2720_v1 = vsub.f32 %v2563_v2, %v2595_v52  ;;  %v4047_v61 = vand.u32 4294901760, %v2683_v58  ;;  %v2742_v41 = vand.u32 4294901760, %v2711_v56  ;;  %v2762_v30 = vand.u32 4294901760, %v2734_v44 }
  0x7e   : > { %4043 = vst [vmem:[#allocation32_spill] sm:$0xff] %v2706_v27  ;;  %4044 = vst [vmem:[#allocation33_spill] sm:$0xff] %v2709_v26  ;;  %v598_v12 = vand.u32 4294901760, %v597_v28  ;;  %v603_v29 = vsub.f32 %v2670_v55, %v4045_v50  ;;  %593 = vmatprep.subr.mxu1 %v592_v37  ;;  %376 = vmatprep.subr.mxu0 %v2662_v19  ;;  %v2728_v28 = vand.u32 4294901760, %v2700_v51  ;;  %v4050_v37 = vand.u32 4294901760, %v2695_v60 }
  0x7f   : > { %4046 = vst [vmem:[#allocation34_spill] sm:$0xff] %v2720_v1  ;;  %v609_v43 = vsub.f32 %v2683_v58, %v4047_v61  ;;  %v2732_v50 = vsub.f32 %v2574_v13, %v2609_v21  ;;  %378 = vmatpush1.msra.mxu0 %v2673_v33  ;;  %4051 = vst [vmem:[#allocation37_spill] sm:$0xff] %v2742_v41  ;;  %v4052_v13 = vand.u32 4294901760, %v2706_v27 }
  0x80   : > { %4048 = vst [vmem:[#allocation35_spill] sm:$0xff] %v2728_v28  ;;  %599 = vmatpush1.msra.mxu1 %v598_v12  ;;  %v604_v2 = vand.u32 4294901760, %v603_v29  ;;  %v615_v52 = vsub.f32 %v2695_v60, %v4050_v37  ;;  %380 = vmatprep.subr.mxu0 %v2686_v46  ;;  %v2753_v21 = vsub.f32 %v2597_v20, %v2628_v7  ;;  %v2755_v37 = vld [vmem:[#allocation2 + $0x1f0] sm:$0xff]  ;;  %4055 = vst [vmem:[#allocation39_spill] sm:$0xff] %v2762_v30  ;;  %v2768_v29 = vld [vmem:[#allocation2 + $0x1e8] sm:$0xff] }
  0x81   : > { %4049 = vst [vmem:[#allocation36_spill] sm:$0xff] %v2732_v50  ;;  %v610_v32 = vand.u32 4294901760, %v609_v43  ;;  %v621_v12 = vsub.f32 %v2706_v27, %v4052_v13  ;;  %382 = vmatpush1.msra.mxu0 %v2698_v14  ;;  %v4054_v43 = vand.u32 4294901760, %v2720_v1  ;;  %v2766_v13 = vsub.f32 %v2620_v38, %v2648_v62 }
  0x82   : > { %4053 = vst [vmem:[#allocation38_spill] sm:$0xff] %v2753_v21  ;;  %605 = vmatprep.subr.mxu1 %v604_v2  ;;  %v616_v61 = vand.u32 4294901760, %v615_v52  ;;  %384 = vmatprep.subr.mxu0 %v2709_v26  ;;  %v4057_v52 = vand.u32 4294901760, %v2732_v50  ;;  %v2787_v62 = vand.u32 4294901760, %v2755_v37 }
  0x83   : > { %v627_v60 = vsub.f32 %v2720_v1, %v4054_v43  ;;  %4056 = vst [vmem:[#allocation40_spill] sm:$0xff] %v2766_v13  ;;  %611 = vmatpush1.msra.mxu1 %v610_v32  ;;  %v622_v20 = vand.u32 4294901760, %v621_v12  ;;  %v2776_v43 = vand.u32 4294901760, %v2744_v36  ;;  %v2778_v1 = vld [vmem:[#allocation2 + $0x1e0] sm:$0xff]  ;;  %386 = vmatpush1.msra.mxu0 %v2728_v28  ;;  %v2784_v12 = vsub.f32 %v2630_v47, %v2662_v19 }
  0x84   : > { %v633_v2 = vsub.f32 %v2732_v50, %v4057_v52  ;;  %617 = vmatprep.subr.mxu1 %v616_v61  ;;  %4060 = vst [vmem:[#allocation43_spill] sm:$0xff] %v2787_v62  ;;  %v2789_v52 = vld [vmem:[#allocation2 + $0x1d8] sm:$0xff]  ;;  %388 = vmatprep.subr.mxu0 %v2742_v41  ;;  %v4061_v61 = vand.u32 4294901760, %v2753_v21  ;;  %v2797_v32 = vsub.f32 %v2641_v49, %v2673_v33  ;;  %v2800_v47 = vand.u32 4294901760, %v2768_v29  ;;  %v2814_v49 = vld [vmem:[#allocation2 + $0x1d0] sm:$0xff] }
  0x85   : > { %4058 = vst [vmem:[#allocation41_spill] sm:$0xff] %v2776_v43  ;;  %v628_v38 = vand.u32 4294901760, %v627_v60  ;;  %4059 = vst [vmem:[#allocation42_spill] sm:$0xff] %v2784_v12  ;;  %623 = vmatpush1.msra.mxu1 %v622_v20  ;;  %390 = vmatpush1.msra.mxu0 %v2762_v30  ;;  %v4064_v19 = vand.u32 4294901760, %v2766_v13  ;;  %v2809_v50 = vsub.f32 %v2654_v39, %v2686_v46  ;;  %v2825_v39 = vld [vmem:[#allocation2 + $0x1c8] sm:$0xff] }
  0x86   : > { %v634_v7 = vand.u32 4294901760, %v633_v2  ;;  %v639_v60 = vsub.f32 %v2753_v21, %v4061_v61  ;;  %4062 = vst [vmem:[#allocation44_spill] sm:$0xff] %v2797_v32  ;;  %4063 = vst [vmem:[#allocation45_spill] sm:$0xff] %v2800_v47  ;;  %v2812_v61 = vand.u32 4294901760, %v2778_v1  ;;  %392 = vmatprep.subr.mxu0 %v2776_v43  ;;  %v2823_v2 = vand.u32 4294901760, %v2789_v52 }
  0x87   : > { %629 = vmatprep.subr.mxu1 %v628_v38  ;;  %v645_v20 = vsub.f32 %v2766_v13, %v4064_v19  ;;  %4065 = vst [vmem:[#allocation46_spill] sm:$0xff] %v2809_v50  ;;  %v3856_v38 = vand.u32 4294901760, %v2797_v32  ;;  %v2820_v19 = vsub.f32 %v2664_v34, %v2698_v14  ;;  %v4069_v13 = vand.u32 4294901760, %v2784_v12  ;;  %394 = vmatpush2.msra.mxu0 %v2787_v62 }
  0x88   : > { %4066 = vst [vmem:[#allocation47_spill] sm:$0xff] %v2812_v61  ;;  %635 = vmatpush1.msra.mxu1 %v634_v7  ;;  %v640_v33 = vand.u32 4294901760, %v639_v60  ;;  %4068 = vst [vmem:[#allocation49_spill] sm:$0xff] %v2823_v2  ;;  %v2834_v60 = vsub.f32 %v2675_v53, %v2709_v26  ;;  %396 = vmatprep.subr.mxu0 %v2800_v47  ;;  %v2842_v14 = vand.u32 4294901760, %v2814_v49  ;;  %v2848_v7 = vld [vmem:[#allocation2 + $0x1c0] sm:$0xff] }
  0x89   : > { %4067 = vst [vmem:[#allocation48_spill] sm:$0xff] %v2820_v19  ;;  %v646_v46 = vand.u32 4294901760, %v645_v20  ;;  %v651_v21 = vsub.f32 %v2784_v12, %v4069_v13  ;;  %v657_v34 = vsub.f32 %v2797_v32, %v3856_v38  ;;  %v2846_v13 = vsub.f32 %v2700_v51, %v2728_v28  ;;  %398 = vmatpush2.msra.mxu0 %v2812_v61  ;;  %v2858_v32 = vld [vmem:[#allocation2 + $0x1b8] sm:$0xff] }
  0x8a   : > { %4070 = vst [vmem:[#allocation50_spill] sm:$0xff] %v2834_v60  ;;  %641 = vmatprep.subr.mxu1 %v640_v33  ;;  %4071 = vst [vmem:[#allocation51_spill] sm:$0xff] %v2842_v14  ;;  %v4073_v33 = vand.u32 4294901760, %v2809_v50  ;;  %v2856_v20 = vand.u32 4294901760, %v2825_v39  ;;  %v4075_v51 = vand.u32 4294901760, %v2820_v19  ;;  %400 = vmatprep.subr.mxu0 %v2823_v2 }
  0x8b   : > { %4072 = vst [vmem:[#allocation52_spill] sm:$0xff] %v2846_v13  ;;  %647 = vmatpush1.msra.mxu1 %v646_v46  ;;  %v652_v53 = vand.u32 4294901760, %v651_v21  ;;  %v658_v12 = vand.u32 4294901760, %v657_v34  ;;  %v2867_v46 = vsub.f32 %v2711_v56, %v2742_v41  ;;  %402 = vmatpush2.msra.mxu0 %v2842_v14  ;;  %v2880_v21 = vsub.f32 %v2734_v44, %v2762_v30  ;;  %v2903_v30 = vld [vmem:[#allocation2 + $0x198] sm:$0xff] }
  0x8c   : > { %v663_v26 = vsub.f32 %v2809_v50, %v4073_v33  ;;  %4074 = vst [vmem:[#allocation53_spill] sm:$0xff] %v2856_v20  ;;  %v669_v28 = vsub.f32 %v2820_v19, %v4075_v51  ;;  %v2869_v33 = vld [vmem:[#allocation2 + $0x1b0] sm:$0xff]  ;;  %v4077_v50 = vand.u32 4294901760, %v2834_v60  ;;  %v2876_v51 = vand.u32 4294901760, %v2848_v7  ;;  %v2882_v19 = vld [vmem:[#allocation2 + $0x1a8] sm:$0xff]  ;;  %404 = vmatprep.subr.mxu0 %v2856_v20 }
  0x8d   : > { %4076 = vst [vmem:[#allocation54_spill] sm:$0xff] %v2867_v46  ;;  %653 = vmatprep.subr.mxu1 %v652_v53  ;;  %4079 = vst [vmem:[#allocation56_spill] sm:$0xff] %v2880_v21  ;;  %v4080_v53 = vand.u32 4294901760, %v2846_v13  ;;  %v2890_v41 = vand.u32 4294901760, %v2858_v32 }
  0x8e   : > { %v664_v38 = vand.u32 4294901760, %v663_v26  ;;  %v675_v34 = vsub.f32 %v2834_v60, %v4077_v50  ;;  %4078 = vst [vmem:[#allocation55_spill] sm:$0xff] %v2876_v51  ;;  %659 = vmatpush1.msra.mxu1 %v658_v12  ;;  %v670_v56 = vand.u32 4294901760, %v669_v28  ;;  %v2892_v60 = vld [vmem:[#allocation2 + $0x1a0] sm:$0xff]  ;;  %406 = vmatpush2.msra.mxu0 %v2876_v51  ;;  %v3879_v12 = vand.u32 4294901760, %v2880_v21 }
  0x8f   : > { %v681_v26 = vsub.f32 %v2846_v13, %v4080_v53  ;;  %4081 = vst [vmem:[#allocation57_spill] sm:$0xff] %v2890_v41  ;;  %v2898_v28 = vsub.f32 %v2744_v36, %v2776_v43  ;;  %v2901_v53 = vand.u32 4294901760, %v2869_v33  ;;  %v4084_v13 = vand.u32 4294901760, %v2867_v46  ;;  %408 = vmatprep.subr.mxu0 %v2890_v41 }
  0x90   : > { %665 = vmatprep.subr.mxu1 %v664_v38  ;;  %v676_v44 = vand.u32 4294901760, %v675_v34  ;;  %v2911_v34 = vsub.f32 %v2755_v37, %v2787_v62  ;;  %v2914_v36 = vand.u32 4294901760, %v2882_v19  ;;  %v693_v43 = vsub.f32 %v2880_v21, %v3879_v12  ;;  %v2928_v37 = vld [vmem:[#allocation2 + $0x190] sm:$0xff] }
  0x91   : > { %4082 = vst [vmem:[#allocation58_spill] sm:$0xff] %v2898_v28  ;;  %4083 = vst [vmem:[#allocation59_spill] sm:$0xff] %v2901_v53  ;;  %671 = vmatpush1.msra.mxu1 %v670_v56  ;;  %v682_v50 = vand.u32 4294901760, %v681_v26  ;;  %v687_v38 = vsub.f32 %v2867_v46, %v4084_v13  ;;  %410 = vmatpush2.msra.mxu0 %v2901_v53  ;;  %v2923_v13 = vsub.f32 %v2768_v29, %v2800_v47  ;;  %v2939_v29 = vld [vmem:[#allocation2 + $0x188] sm:$0xff] }
  0x92   : > { %4085 = vst [vmem:[#allocation60_spill] sm:$0xff] %v2911_v34  ;;  %4086 = vst [vmem:[#allocation61_spill] sm:$0xff] %v2914_v36  ;;  %677 = vmatprep.subr.mxu1 %v676_v44  ;;  %v2926_v26 = vand.u32 4294901760, %v2892_v60  ;;  %v3890_v44 = vand.u32 4294901760, %v2911_v34  ;;  %412 = vmatprep.subr.mxu0 %v2914_v36  ;;  %v2934_v12 = vsub.f32 %v2778_v1, %v2812_v61  ;;  %v2937_v56 = vand.u32 4294901760, %v2903_v30 }
  0x93   : > { %4087 = vst [vmem:[#allocation62_spill] sm:$0xff] %v2923_v13  ;;  %683 = vmatpush1.msra.mxu1 %v682_v50  ;;  %v688_v62 = vand.u32 4294901760, %v687_v38  ;;  %v694_v47 = vand.u32 4294901760, %v693_v43  ;;  %v4091_v21 = vand.u32 4294901760, %v2898_v28  ;;  %v2948_v38 = vsub.f32 %v2789_v52, %v2823_v2  ;;  %v2962_v50 = vld [vmem:[#allocation2 + $0x180] sm:$0xff] }
  0x94   : > { %4088 = vst [vmem:[#allocation63_spill] sm:$0xff] %v2926_v26  ;;  %4089 = vst [vmem:[#allocation64_spill] sm:$0xff] %v2934_v12  ;;  %414 = vmatpush2.msra.mxu0 %v2926_v26  ;;  %v705_v1 = vsub.f32 %v2911_v34, %v3890_v44  ;;  %v2956_v43 = vand.u32 4294901760, %v2928_v37  ;;  %v2969_v61 = vand.u32 4294901760, %v2939_v29  ;;  %v2971_v34 = vld [vmem:[#allocation2 + $0x178] sm:$0xff]  ;;  %v4097_v27 = vand.u32 4294901760, %v2934_v12 }
  0x95   : > { %4090 = vst [vmem:[#allocation65_spill] sm:$0xff] %v2937_v56  ;;  %v699_v46 = vsub.f32 %v2898_v28, %v4091_v21  ;;  %4092 = vst [vmem:[#allocation66_spill] sm:$0xff] %v2948_v38  ;;  %689 = vmatprep.subr.mxu1 %v688_v62  ;;  %416 = vmatprep.subr.mxu0 %v2937_v56  ;;  %v2960_v21 = vsub.f32 %v2814_v49, %v2842_v14  ;;  %v4095_v62 = vand.u32 4294901760, %v2923_v13 }
  0x96   : > { %4093 = vst [vmem:[#allocation67_spill] sm:$0xff] %v2956_v43  ;;  %695 = vmatpush1.msra.mxu1 %v694_v47  ;;  %4096 = vst [vmem:[#allocation69_spill] sm:$0xff] %v2969_v61  ;;  %v706_v28 = vand.u32 4294901760, %v705_v1  ;;  %v717_v49 = vsub.f32 %v2934_v12, %v4097_v27  ;;  %418 = vmatpush2.msra.mxu0 %v2956_v43  ;;  %v4099_v14 = vand.u32 4294901760, %v2948_v38  ;;  %v2989_v27 = vand.u32 4294901760, %v2962_v50  ;;  %v2995_v12 = vld [vmem:[#allocation2 + $0x168] sm:$0xff] }
  0x97   : > { %4094 = vst [vmem:[#allocation68_spill] sm:$0xff] %v2960_v21  ;;  %v700_v52 = vand.u32 4294901760, %v699_v46  ;;  %v711_v2 = vsub.f32 %v2923_v13, %v4095_v62  ;;  %v2980_v46 = vsub.f32 %v2825_v39, %v2856_v20  ;;  %v2982_v62 = vld [vmem:[#allocation2 + $0x170] sm:$0xff]  ;;  %420 = vmatprep.subr.mxu0 %v2969_v61  ;;  %v2993_v47 = vsub.f32 %v2848_v7, %v2876_v51 }
  0x98   : > { %v723_v1 = vsub.f32 %v2948_v38, %v4099_v14  ;;  %4100 = vst [vmem:[#allocation71_spill] sm:$0xff] %v2989_v27  ;;  %v718_v39 = vand.u32 4294901760, %v717_v49  ;;  %v3002_v14 = vand.u32 4294901760, %v2971_v34  ;;  %v3004_v38 = vld [vmem:[#allocation2 + $0x160] sm:$0xff]  ;;  %422 = vmatpush2.msra.mxu0 %v2989_v27  ;;  %v3013_v49 = vand.u32 4294901760, %v2982_v62 }
  0x99   : > { %4098 = vst [vmem:[#allocation70_spill] sm:$0xff] %v2980_v46  ;;  %701 = vmatprep.subr.mxu1 %v700_v52  ;;  %v712_v44 = vand.u32 4294901760, %v711_v2  ;;  %4101 = vst [vmem:[#allocation72_spill] sm:$0xff] %v2993_v47  ;;  %v4102_v52 = vand.u32 4294901760, %v2960_v21  ;;  %v3913_v7 = vand.u32 4294901760, %v2993_v47  ;;  %v4106_v51 = vand.u32 4294901760, %v2980_v46 }
  0x9a   : > { %707 = vmatpush2.msra.mxu1 %v706_v28  ;;  %4103 = vst [vmem:[#allocation73_spill] sm:$0xff] %v3002_v14  ;;  %v724_v13 = vand.u32 4294901760, %v723_v1  ;;  %v3010_v28 = vsub.f32 %v2858_v32, %v2890_v41  ;;  %4105 = vst [vmem:[#allocation75_spill] sm:$0xff] %v3013_v49  ;;  %424 = vmatprep.subr.mxu0 %v3002_v14  ;;  %v3023_v1 = vsub.f32 %v2869_v33, %v2901_v53  ;;  %v3040_v33 = vld [vmem:[#allocation2 + $0x150] sm:$0xff] }
  0x9b   : > { %v729_v2 = vsub.f32 %v2960_v21, %v4102_v52  ;;  %713 = vmatprep.subr.mxu1 %v712_v44  ;;  %v3015_v52 = vld [vmem:[#allocation2 + $0x158] sm:$0xff]  ;;  %v735_v44 = vsub.f32 %v2980_v46, %v4106_v51  ;;  %v3026_v32 = vand.u32 4294901760, %v2995_v12  ;;  %v741_v41 = vsub.f32 %v2993_v47, %v3913_v7  ;;  %426 = vmatpush2.msra.mxu0 %v3013_v49 }
  0x9c   : > { %4104 = vst [vmem:[#allocation74_spill] sm:$0xff] %v3010_v28  ;;  %719 = vmatpush2.msra.mxu1 %v718_v39  ;;  %4107 = vst [vmem:[#allocation76_spill] sm:$0xff] %v3023_v1  ;;  %v3035_v51 = vsub.f32 %v2882_v19, %v2914_v36  ;;  %v3046_v7 = vsub.f32 %v2892_v60, %v2926_v26  ;;  %v3049_v39 = vand.u32 4294901760, %v3015_v52  ;;  %v3051_v19 = vld [vmem:[#allocation2 + $0x148] sm:$0xff]  ;;  %v4113_v47 = vand.u32 4294901760, %v3010_v28 }
  0x9d   : > { %v730_v20 = vand.u32 4294901760, %v729_v2  ;;  %4108 = vst [vmem:[#allocation77_spill] sm:$0xff] %v3026_v32  ;;  %725 = vmatprep.subr.mxu1 %v724_v13  ;;  %v3038_v2 = vand.u32 4294901760, %v3004_v38  ;;  %v736_v53 = vand.u32 4294901760, %v735_v44  ;;  %v3924_v13 = vand.u32 4294901760, %v3023_v1  ;;  %428 = vmatprep.subr.mxu0 %v3026_v32 }
  0x9e   : > { %4109 = vst [vmem:[#allocation78_spill] sm:$0xff] %v3035_v51  ;;  %4111 = vst [vmem:[#allocation80_spill] sm:$0xff] %v3046_v7  ;;  %v742_v36 = vand.u32 4294901760, %v741_v41  ;;  %v747_v46 = vsub.f32 %v3010_v28, %v4113_v47  ;;  %v3060_v44 = vsub.f32 %v2903_v30, %v2937_v56  ;;  %v3068_v41 = vand.u32 4294901760, %v3040_v33 }
  0x9f   : > { %4110 = vst [vmem:[#allocation79_spill] sm:$0xff] %v3038_v2  ;;  %731 = vmatpush2.msra.mxu1 %v730_v20  ;;  %4112 = vst [vmem:[#allocation81_spill] sm:$0xff] %v3049_v39  ;;  %430 = vmatpush2.msra.mxu0 %v3038_v2  ;;  %v753_v60 = vsub.f32 %v3023_v1, %v3924_v13  ;;  %v3072_v47 = vsub.f32 %v2928_v37, %v2956_v43  ;;  %v3074_v20 = vld [vmem:[#allocation2 + $0x140] sm:$0xff]  ;;  %v3081_v26 = vand.u32 4294901760, %v3051_v19  ;;  %v3083_v1 = vld [vmem:[#allocation2 + $0x138] sm:$0xff] }
  0xa0   : > { %4114 = vst [vmem:[#allocation82_spill] sm:$0xff] %v3060_v44  ;;  %737 = vmatprep.subr.mxu1 %v736_v53  ;;  %432 = vmatprep.subr.mxu0 %v3049_v39  ;;  %4115 = vst [vmem:[#allocation83_spill] sm:$0xff] %v3068_v41  ;;  %v748_v30 = vand.u32 4294901760, %v747_v46  ;;  %v4117_v53 = vand.u32 4294901760, %v3035_v51  ;;  %v4119_v21 = vand.u32 4294901760, %v3046_v7  ;;  %v3092_v46 = vsub.f32 %v2939_v29, %v2969_v61 }
  0xa1   : > { %4116 = vst [vmem:[#allocation84_spill] sm:$0xff] %v3072_v47  ;;  %743 = vmatpush2.msra.mxu1 %v742_v36  ;;  %4118 = vst [vmem:[#allocation85_spill] sm:$0xff] %v3081_v26  ;;  %v754_v28 = vand.u32 4294901760, %v753_v60  ;;  %434 = vmatpush2.msra.mxu0 %v3068_v41  ;;  %v4121_v43 = vand.u32 4294901760, %v3060_v44  ;;  %v3105_v36 = vsub.f32 %v2962_v50, %v2989_v27 }
  0xa2   : > { %v759_v56 = vsub.f32 %v3035_v51, %v4117_v53  ;;  %v765_v37 = vsub.f32 %v3046_v7, %v4119_v21  ;;  %4120 = vst [vmem:[#allocation86_spill] sm:$0xff] %v3092_v46  ;;  %v3094_v53 = vld [vmem:[#allocation2 + $0x130] sm:$0xff]  ;;  %749 = vmatprep.subr.mxu1 %v748_v30  ;;  %436 = vmatprep.subr.mxu0 %v3081_v26  ;;  %v3101_v21 = vand.u32 4294901760, %v3074_v20  ;;  %v3107_v7 = vld [vmem:[#allocation2 + $0x128] sm:$0xff]  ;;  %v4124_v30 = vand.u32 4294901760, %v3072_v47 }
  0xa3   : > { %v771_v60 = vsub.f32 %v3060_v44, %v4121_v43  ;;  %4123 = vst [vmem:[#allocation88_spill] sm:$0xff] %v3105_v36  ;;  %755 = vmatpush2.msra.mxu1 %v754_v28  ;;  %v3114_v43 = vand.u32 4294901760, %v3083_v1  ;;  %v3116_v44 = vld [vmem:[#allocation2 + $0x120] sm:$0xff]  ;;  %v3947_v50 = vand.u32 4294901760, %v3105_v36  ;;  %v3122_v28 = vsub.f32 %v2971_v34, %v3002_v14 }
  0xa4   : > { %v760_v13 = vand.u32 4294901760, %v759_v56  ;;  %4122 = vst [vmem:[#allocation87_spill] sm:$0xff] %v3101_v21  ;;  %v766_v29 = vand.u32 4294901760, %v765_v37  ;;  %v777_v56 = vsub.f32 %v3072_v47, %v4124_v30  ;;  %438 = vmatpush2.msra.mxu0 %v3101_v21  ;;  %v3125_v37 = vand.u32 4294901760, %v3094_v53  ;;  %v3127_v30 = vld [vmem:[#allocation2 + $0x118] sm:$0xff] }
  0xa5   : > { %4125 = vst [vmem:[#allocation89_spill] sm:$0xff] %v3114_v43  ;;  %v772_v51 = vand.u32 4294901760, %v771_v60  ;;  %4126 = vst [vmem:[#allocation90_spill] sm:$0xff] %v3122_v28  ;;  %v4128_v27 = vand.u32 4294901760, %v3092_v46  ;;  %440 = vmatprep.subr.mxu0 %v3114_v43  ;;  %v3135_v60 = vsub.f32 %v2982_v62, %v3013_v49  ;;  %v3138_v34 = vand.u32 4294901760, %v3107_v7  ;;  %v3152_v62 = vld [vmem:[#allocation2 + $0x110] sm:$0xff] }
  0xa6   : > { %761 = vmatprep.subr.mxu1 %v760_v13  ;;  %4127 = vst [vmem:[#allocation91_spill] sm:$0xff] %v3125_v37  ;;  %v778_v61 = vand.u32 4294901760, %v777_v56  ;;  %v789_v14 = vsub.f32 %v3105_v36, %v3947_v50  ;;  %442 = vmatpush2.msra.mxu0 %v3125_v37  ;;  %v3150_v56 = vand.u32 4294901760, %v3116_v44  ;;  %v3158_v50 = vsub.f32 %v3004_v38, %v3038_v2  ;;  %v3186_v2 = vld [vmem:[#allocation2 + $0x100] sm:$0xff] }
  0xa7   : > { %767 = vmatpush2.msra.mxu1 %v766_v29  ;;  %v783_v13 = vsub.f32 %v3092_v46, %v4128_v27  ;;  %4129 = vst [vmem:[#allocation92_spill] sm:$0xff] %v3135_v60  ;;  %v3147_v27 = vsub.f32 %v2995_v12, %v3026_v32  ;;  %444 = vmatprep.subr.mxu0 %v3138_v34  ;;  %v3161_v29 = vand.u32 4294901760, %v3127_v30  ;;  %v3163_v12 = vld [vmem:[#allocation2 + $0x108] sm:$0xff]  ;;  %v4134_v36 = vand.u32 4294901760, %v3122_v28 }
  0xa8   : > { %773 = vmatprep.subr.mxu1 %v772_v51  ;;  %4131 = vst [vmem:[#allocation94_spill] sm:$0xff] %v3150_v56  ;;  %v3956_v51 = vand.u32 4294901760, %v3135_v60  ;;  %4132 = vst [vmem:[#allocation95_spill] sm:$0xff] %v3158_v50  ;;  %v790_v32 = vand.u32 4294901760, %v789_v14  ;;  %446 = vmatpush2.msra.mxu0 %v3150_v56 }
  0xa9   : > { %4130 = vst [vmem:[#allocation93_spill] sm:$0xff] %v3147_v27  ;;  %779 = vmatpush2.msra.mxu1 %v778_v61  ;;  %v784_v49 = vand.u32 4294901760, %v783_v13  ;;  %4133 = vst [vmem:[#allocation96_spill] sm:$0xff] %v3161_v29  ;;  %v795_v46 = vsub.f32 %v3122_v28, %v4134_v36  ;;  %v3172_v13 = vsub.f32 %v3015_v52, %v3049_v39  ;;  %448 = vmatprep.subr.mxu0 %v3161_v29 }
  0xaa   : > { %v801_v38 = vsub.f32 %v3135_v60, %v3956_v51  ;;  %v3180_v36 = vand.u32 4294901760, %v3152_v62  ;;  %v3184_v61 = vsub.f32 %v3040_v33, %v3068_v41  ;;  %v4137_v52 = vand.u32 4294901760, %v3147_v27  ;;  %v3197_v60 = vld [vmem:[%s200_s10] sm:$0xff] }
  0xab   : > { %4135 = vst [vmem:[#allocation97_spill] sm:$0xff] %v3172_v13  ;;  %785 = vmatprep.subr.mxu1 %v784_v49  ;;  %v796_v49 = vand.u32 4294901760, %v795_v46  ;;  %v3193_v39 = vand.u32 4294901760, %v3163_v12  ;;  %4139 = vst [vmem:[#allocation100_spill] sm:$0xff] %v3197_v60  ;;  %v4140_v33 = vand.u32 4294901760, %v3158_v50  ;;  %v3206_v46 = vsub.f32 %v3051_v19, %v3081_v26 }
  0xac   : > { %4136 = vst [vmem:[#allocation98_spill] sm:$0xff] %v3180_v36  ;;  %791 = vmatpush2.msra.mxu1 %v790_v32  ;;  %v807_v51 = vsub.f32 %v3147_v27, %v4137_v52  ;;  %v802_v28 = vand.u32 4294901760, %v801_v38  ;;  %450 = vmatpush2.msra.mxu0 %v3180_v36  ;;  %v3209_v52 = vld [vmem:[%s209_s24] sm:$0xff]  ;;  %v4142_v27 = vand.u32 4294901760, %v3172_v13  ;;  %v3220_v32 = vsub.f32 %v3074_v20, %v3101_v21 }
  0xad   : > { %4138 = vst [vmem:[#allocation99_spill] sm:$0xff] %v3193_v39  ;;  %v813_v41 = vsub.f32 %v3158_v50, %v4140_v33  ;;  %4141 = vst [vmem:[#allocation101_spill] sm:$0xff] %v3209_v52  ;;  %797 = vmatprep.subr.mxu1 %v796_v49  ;;  %452 = vmatprep.subr.mxu0 %v3193_v39  ;;  %v3216_v33 = vand.u32 4294901760, %v3186_v2  ;;  %v4143_v26 = vand.u32 4294901760, %v3184_v61 }
  0xae   : > { %v808_v14 = vand.u32 4294901760, %v807_v51  ;;  %v819_v38 = vsub.f32 %v3172_v13, %v4142_v27  ;;  %803 = vmatpush2.msra.mxu1 %v802_v28  ;;  %v3973_v51 = vand.u32 4294901760, %v3206_v46  ;;  %v244_v27 = vcombine.high %v3197_v60, %v3197_v60 }
  0xaf   : > { %v814_v19 = vand.u32 4294901760, %v813_v41  ;;  %v825_v49 = vsub.f32 %v3184_v61, %v4143_v26  ;;  %454 = vmatpush2.msra.mxu0 %v3216_v33  ;;  %v3977_v50 = vand.u32 4294901760, %v3220_v32  ;;  %v3232_v20 = vsub.f32 %v3083_v1, %v3114_v43 }
  0xb0   : > { %809 = vmatprep.subr.mxu1 %v808_v14  ;;  %v820_v13 = vand.u32 4294901760, %v819_v38  ;;  %v247_v41 = vcombine.low %v3209_v52, %v3209_v52  ;;  %v831_v28 = vsub.f32 %v3206_v46, %v3973_v51  ;;  %v260_v14 = vsel %vm258_vm0, %v244_v27, %v3209_v52  ;;  %915 = vmatprep.subr.mxu0 %v2451_v18 }
  0xb1   : > { %815 = vmatpush2.msra.mxu1 %v814_v19  ;;  %v826_v26 = vand.u32 4294901760, %v825_v49  ;;  %v3244_v38 = vsub.f32 %v3094_v53, %v3125_v37  ;;  %v837_v1 = vsub.f32 %v3220_v32, %v3977_v50  ;;  %v3249_v19 = vand.u32 4294901760, %v260_v14 }
  0xb2   : > { %821 = vmatprep.subr.mxu1 %v820_v13  ;;  %v3980_v49 = vand.u32 4294901760, %v3232_v20  ;;  %v259_v51 = vsel %vm258_vm0, %v3197_v60, %v247_v41  ;;  %v832_v27 = vand.u32 4294901760, %v831_v28  ;;  %v3259_v53 = vsub.f32 %v3107_v7, %v3138_v34 }
  0xb3   : > { %4144 = vst [vmem:[#allocation102_spill] sm:$0xff] %v3249_v19  ;;  %827 = vmatpush2.msra.mxu1 %v826_v26  ;;  %v3254_v43 = vand.u32 4294901760, %v259_v51  ;;  %v3983_v18 = vand.u32 4294901760, %v3244_v38  ;;  %v838_v13 = vand.u32 4294901760, %v837_v1  ;;  %v3262_v50 = vsub.f32 %v260_v14, %v3249_v19  ;;  %889 = vmatprep.mubr.f32.mxu1 %v3249_v19 }
  0xb4   : > { %v843_v37 = vsub.f32 %v3232_v20, %v3980_v49  ;;  %v3269_v41 = vsub.f32 %v3116_v44, %v3150_v56  ;;  %833 = vmatprep.subr.mxu1 %v832_v27  ;;  %v3984_v28 = vand.u32 4294901760, %v3259_v53  ;;  %v3281_v14 = vsub.f32 %v3127_v30, %v3161_v29 }
  0xb5   : > { %4145 = vst [vmem:[#allocation103_spill] sm:$0xff] %v3254_v43  ;;  %v3273_v26 = vsub.f32 %v259_v51, %v3254_v43  ;;  %v849_v7 = vsub.f32 %v3244_v38, %v3983_v18  ;;  %839 = vmatpush2.msra.mxu1 %v838_v13  ;;  %v3987_v44 = vand.u32 4294901760, %v3262_v50  ;;  %v3287_v51 = vsub.f32 %v3152_v62, %v3180_v36 }
  0xb6   : > { %v844_v1 = vand.u32 4294901760, %v843_v37  ;;  %v3988_v49 = vand.u32 4294901760, %v3269_v41  ;;  %v855_v18 = vsub.f32 %v3259_v53, %v3984_v28  ;;  %v4146_v36 = vand.u32 4294901760, %v3281_v14 }
  0xb7   : > { %v3997_v27 = vand.u32 4294901760, %v3273_v26  ;;  %v850_v19 = vand.u32 4294901760, %v849_v7  ;;  %v458_v13 = vsub.f32 %v3262_v50, %v3987_v44  ;;  %v3303_v7 = vsub.f32 %v3163_v12, %v3193_v39 }
  0xb8   : > { %845 = vmatprep.subr.mxu1 %v844_v1  ;;  %v861_v37 = vsub.f32 %v3269_v41, %v3988_v49  ;;  %v856_v30 = vand.u32 4294901760, %v855_v18  ;;  %v867_v1 = vsub.f32 %v3281_v14, %v4146_v36  ;;  %v3313_v44 = vsub.f32 %v3186_v2, %v3216_v33 }
  0xb9   : > { %v464_v28 = vsub.f32 %v3273_v26, %v3997_v27  ;;  %851 = vmatpush2.msra.mxu1 %v850_v19  ;;  %v459_v49 = vand.u32 4294901760, %v458_v13  ;;  %v4147_v29 = vand.u32 4294901760, %v3287_v51  ;;  %v3996_v39 = vand.u32 4294901760, %v3303_v7  ;;  %v4150_v13 = vld [vmem:[#allocation15_spill] sm:$0xff]  ;;  %v4162_v27 = vld [vmem:[#allocation21_spill] sm:$0xff] }
  0xba   : > { %v862_v62 = vand.u32 4294901760, %v861_v37  ;;  %857 = vmatprep.subr.mxu1 %v856_v30  ;;  %v868_v19 = vand.u32 4294901760, %v867_v1  ;;  %v3995_v18 = vand.u32 4294901760, %v3313_v44  ;;  %v4151_v37 = vld [vmem:[#allocation32_spill] sm:$0xff]  ;;  %v4153_v1 = vld [vmem:[#allocation34_spill] sm:$0xff] }
  0xbb   : > { %v873_v12 = vsub.f32 %v3287_v51, %v4147_v29  ;;  %v465_v56 = vand.u32 4294901760, %v464_v28  ;;  %460 = vmatprep.mubr.f32.mxu0 %v459_v49  ;;  %v879_v2 = vsub.f32 %v3303_v7, %v3996_v39  ;;  %v4149_v49 = vld [vmem:[#allocation30_spill] sm:$0xff] }
  0xbc   : > { %863 = vmatpush2.msra.mxu1 %v862_v62  ;;  %v885_v29 = vsub.f32 %v3313_v44, %v3995_v18  ;;  %v4152_v62 = vld [vmem:[#allocation16_spill] sm:$0xff]  ;;  %v4161_v39 = vld [vmem:[#allocation42_spill] sm:$0xff] }
  0xbd   : > { %v874_v36 = vand.u32 4294901760, %v873_v12  ;;  %466 = vmatmul.mubr.f32.vlgmr.msra.gmra.mxu0 %v465_v56  ;;  %869 = vmatprep.subr.mxu1 %v868_v19  ;;  %v880_v28 = vand.u32 4294901760, %v879_v2  ;;  %v4148_v56 = vld [vmem:[#allocation14_spill] sm:$0xff]  ;;  %v4154_v12 = vld [vmem:[#allocation17_spill] sm:$0xff]  ;;  %v4155_v19 = vld [vmem:[#allocation36_spill] sm:$0xff] }
  0xbe   : > { %918 = vmatpush1.msra.mxu0 %v2464_v23  ;;  %v886_v30 = vand.u32 4294901760, %v885_v29  ;;  %v4157_v2 = vld [vmem:[#allocation38_spill] sm:$0xff]  ;;  %v4158_v29 = vld [vmem:[#allocation19_spill] sm:$0xff]  ;;  %v4160_v18 = vld [vmem:[#allocation20_spill] sm:$0xff] }
  0xbf   : > { %875 = vmatpush2.msra.mxu1 %v874_v36  ;;  %921 = vmatprep.subr.mxu0 %v2470_v25  ;;  %v4156_v36 = vld [vmem:[#allocation18_spill] sm:$0xff] }
  0xc0   : > { %924 = vmatpush1.msra.mxu0 %v2484_v31  ;;  %881 = vmatprep.subr.mxu1 %v880_v28  ;;  %v240_v28 = vmul.f32 %v3197_v60, %v3197_v60 }
  0xc1   : > { %927 = vmatprep.subr.mxu0 %v2493_v35  ;;  %887 = vmatpush2.msra.mxu1 %v886_v30  ;;  %v4159_v30 = vld [vmem:[#allocation40_spill] sm:$0xff] }
  0xc2   : > { %930 = vmatpush1.msra.mxu0 %v2506_v40  ;;  %891 = vmatmul.mubr.f32.vlgmr.msra.gmra.mxu1 %v3254_v43  ;;  %v4163_v43 = vld [vmem:[#allocation44_spill] sm:$0xff] }
  0xc3   : > { %933 = vmatprep.subr.mxu0 %v2520_v45  ;;  %1137 = vmatprep.subr.mxu1 %v2431_v3 }
  0xc4   : > { %936 = vmatpush1.msra.mxu0 %v2546_v59  ;;  %1139 = vmatpush1.msra.mxu1 %v2433_v4 }
  0xc5   : > { %939 = vmatprep.subr.mxu0 %v2558_v0  ;;  %1141 = vmatprep.subr.mxu1 %v2435_v5 }
  0xc6   : > { %942 = vmatpush1.msra.mxu0 %v2569_v8  ;;  %1143 = vmatpush1.msra.mxu1 %v2437_v9 }
  0xc7   : > { %945 = vmatprep.subr.mxu0 %v2580_v42  ;;  %1145 = vmatprep.subr.mxu1 %v2439_v10 }
  0xc8   : > { %948 = vmatpush1.msra.mxu0 %v2592_v48  ;;  %1147 = vmatpush1.msra.mxu1 %v2441_v11 }
  0xc9   : > { %951 = vmatprep.subr.mxu0 %v2606_v57  ;;  %1149 = vmatprep.subr.mxu1 %v2444_v15 }
  0xca   : > { %954 = vmatpush1.msra.mxu0 %v2618_v6  ;;  %1151 = vmatpush1.msra.mxu1 %v2446_v16 }
  0xcb   : > { %957 = vmatprep.subr.mxu0 %v2639_v54  ;;  %1153 = vmatprep.subr.mxu1 %v2448_v17 }
  0xcc   : > { %960 = vmatpush1.msra.mxu0 %v2652_v63  ;;  %1155 = vmatpush1.msra.mxu1 %v2461_v22 }
  0xcd   : > { %963 = vmatprep.subr.mxu0 %v2670_v55  ;;  %1157 = vmatprep.subr.mxu1 %v2467_v24  ;;  %v4215_v24 = vld [vmem:[#allocation92_spill] sm:$0xff] }
  0xce   : > { %966 = vmatpush1.msra.mxu0 %v2683_v58  ;;  %1159 = vmatpush1.msra.mxu1 %v4148_v56  ;;  %v4202_v56 = vld [vmem:[#allocation80_spill] sm:$0xff] }
  0xcf   : > { %969 = vmatprep.subr.mxu0 %v4149_v49  ;;  %1161 = vmatprep.subr.mxu1 %v4150_v13  ;;  %v4173_v13 = vld [vmem:[#allocation54_spill] sm:$0xff] }
  0xd0   : > { %972 = vmatpush1.msra.mxu0 %v4151_v37  ;;  %1163 = vmatpush1.msra.mxu1 %v4152_v62  ;;  %v250_v62 = vcombine.high %v240_v28, %v240_v28  ;;  %v4205_v37 = vld [vmem:[#allocation53_spill] sm:$0xff] }
  0xd1   : > { %975 = vmatprep.subr.mxu0 %v4153_v1  ;;  %1165 = vmatprep.subr.mxu1 %v4154_v12  ;;  %v4164_v12 = vld [vmem:[#allocation22_spill] sm:$0xff]  ;;  %v4174_v1 = vld [vmem:[#allocation27_spill] sm:$0xff] }
  0xd2   : > { %978 = vmatpush1.msra.mxu0 %v4155_v19  ;;  %1167 = vmatpush1.msra.mxu1 %v4156_v36  ;;  %v241_v36 = vmul.f32 %v3209_v52, %v3209_v52  ;;  %v4167_v19 = vld [vmem:[#allocation48_spill] sm:$0xff] }
  0xd3   : > { %981 = vmatprep.subr.mxu0 %v4157_v2  ;;  %1169 = vmatprep.subr.mxu1 %v4158_v29  ;;  %v4165_v2 = vld [vmem:[#allocation46_spill] sm:$0xff]  ;;  %v4166_v29 = vld [vmem:[#allocation23_spill] sm:$0xff] }
  0xd4   : > { %984 = vmatpush1.msra.mxu0 %v4159_v30  ;;  %1171 = vmatpush1.msra.mxu1 %v4160_v18  ;;  %v4168_v30 = vld [vmem:[#allocation24_spill] sm:$0xff]  ;;  %v4169_v18 = vld [vmem:[#allocation50_spill] sm:$0xff] }
  0xd5   : > { %987 = vmatprep.subr.mxu0 %v4161_v39  ;;  %1173 = vmatprep.subr.mxu1 %v4162_v27  ;;  %v4170_v39 = vld [vmem:[#allocation25_spill] sm:$0xff]  ;;  %v4171_v27 = vld [vmem:[#allocation52_spill] sm:$0xff] }
  0xd6   : > { %990 = vmatpush1.msra.mxu0 %v4163_v43  ;;  %1175 = vmatpush1.msra.mxu1 %v4164_v12  ;;  %v4172_v43 = vld [vmem:[#allocation26_spill] sm:$0xff]  ;;  %v253_v12 = vcombine.low %v241_v36, %v241_v36 }
  0xd7   : > { %993 = vmatprep.subr.mxu0 %v4165_v2  ;;  %1177 = vmatprep.subr.mxu1 %v4166_v29  ;;  %v262_v29 = vsel %vm258_vm0, %v250_v62, %v241_v36  ;;  %v4175_v2 = vld [vmem:[#allocation56_spill] sm:$0xff]  ;;  %v4182_v62 = vld [vmem:[#allocation62_spill] sm:$0xff]  ;;  %v4183_v36 = vld [vmem:[#allocation33_spill] sm:$0xff] }
  0xd8   : > { %996 = vmatpush1.msra.mxu0 %v4167_v19  ;;  %1179 = vmatpush1.msra.mxu1 %v4168_v30  ;;  %v4176_v19 = vld [vmem:[#allocation28_spill] sm:$0xff]  ;;  %v242_v30 = vmul.f32 %v3209_v52, %v3197_v60  ;;  %v4186_v52 = vld [vmem:[#allocation66_spill] sm:$0xff] }
  0xd9   : > { %999 = vmatprep.subr.mxu0 %v4169_v18  ;;  %1181 = vmatprep.subr.mxu1 %v4170_v39  ;;  %v4177_v18 = vld [vmem:[#allocation58_spill] sm:$0xff]  ;;  %v4178_v39 = vld [vmem:[#allocation29_spill] sm:$0xff] }
  0xda   : > { %1002 = vmatpush1.msra.mxu0 %v4171_v27  ;;  %1183 = vmatpush1.msra.mxu1 %v4172_v43  ;;  %v4179_v27 = vld [vmem:[#allocation60_spill] sm:$0xff]  ;;  %v4180_v43 = vld [vmem:[#allocation31_spill] sm:$0xff]  ;;  %v256_v60 = vcombine.high %v242_v30, %v242_v30 }
  0xdb   : > { %1005 = vmatprep.subr.mxu0 %v4173_v13  ;;  %1185 = vmatprep.subr.mxu1 %v4174_v1  ;;  %v3395_v13 = vand.u32 4294901760, %v262_v29  ;;  %v261_v1 = vsel %vm258_vm0, %v240_v28, %v253_v12  ;;  %v4191_v28 = vld [vmem:[#allocation70_spill] sm:$0xff] }
  0xdc   : > { %1008 = vmatpush1.msra.mxu0 %v4175_v2  ;;  %1187 = vmatpush1.msra.mxu1 %v4176_v19  ;;  %v4184_v19 = vld [vmem:[#allocation64_spill] sm:$0xff]  ;;  %v4185_v2 = vld [vmem:[#allocation35_spill] sm:$0xff] }
  0xdd   : > { %1011 = vmatprep.subr.mxu0 %v4177_v18  ;;  %1189 = vmatprep.subr.mxu1 %v4178_v39  ;;  %4181 = vst [vmem:[#allocation104_spill] sm:$0xff] %v3395_v13  ;;  %v4187_v39 = vld [vmem:[#allocation37_spill] sm:$0xff]  ;;  %v4190_v18 = vld [vmem:[#allocation39_spill] sm:$0xff]  ;;  %v3409_v12 = vsub.f32 %v262_v29, %v3395_v13  ;;  %v4198_v29 = vld [vmem:[#allocation76_spill] sm:$0xff] }
  0xde   : > { %1014 = vmatpush2.msra.mxu0 %v4179_v27  ;;  %1191 = vmatpush1.msra.mxu1 %v4180_v43  ;;  %v3404_v27 = vand.u32 4294901760, %v261_v1  ;;  %v4189_v43 = vld [vmem:[#allocation68_spill] sm:$0xff] }
  0xdf   : > { %1017 = vmatprep.subr.mxu0 %v4182_v62  ;;  %1193 = vmatprep.subr.mxu1 %v4183_v36  ;;  %v4192_v36 = vld [vmem:[#allocation41_spill] sm:$0xff] }
  0xe0   : > { %1020 = vmatpush2.msra.mxu0 %v4184_v19  ;;  %1195 = vmatpush1.msra.mxu1 %v4185_v2  ;;  %4188 = vst [vmem:[#allocation105_spill] sm:$0xff] %v3404_v27  ;;  %v4193_v19 = vld [vmem:[#allocation72_spill] sm:$0xff]  ;;  %v4194_v2 = vld [vmem:[#allocation43_spill] sm:$0xff]  ;;  %v4197_v62 = vld [vmem:[#allocation45_spill] sm:$0xff] }
  0xe1   : > { %1023 = vmatprep.subr.mxu0 %v4186_v52  ;;  %1197 = vmatprep.subr.mxu1 %v4187_v39  ;;  %v3415_v52 = vand.u32 4294901760, %v256_v60  ;;  %v4196_v39 = vld [vmem:[#allocation74_spill] sm:$0xff] }
  0xe2   : > { %1026 = vmatpush2.msra.mxu0 %v4189_v43  ;;  %1199 = vmatpush1.msra.mxu1 %v4190_v18  ;;  %v3420_v43 = vsub.f32 %v261_v1, %v3404_v27  ;;  %v3422_v18 = vand.u32 4294901760, %v242_v30  ;;  %v4204_v1 = vld [vmem:[#allocation82_spill] sm:$0xff] }
  0xe3   : > { %1029 = vmatprep.subr.mxu0 %v4191_v28  ;;  %1201 = vmatprep.subr.mxu1 %v4192_v36  ;;  %4195 = vst [vmem:[#allocation106_spill] sm:$0xff] %v3415_v52  ;;  %v4199_v28 = vld [vmem:[#allocation47_spill] sm:$0xff] }
  0xe4   : > { %1032 = vmatpush2.msra.mxu0 %v4193_v19  ;;  %1203 = vmatpush2.msra.mxu1 %v4194_v2  ;;  %v4200_v19 = vld [vmem:[#allocation78_spill] sm:$0xff]  ;;  %v4201_v2 = vld [vmem:[#allocation49_spill] sm:$0xff]  ;;  %v4206_v36 = vld [vmem:[#allocation55_spill] sm:$0xff] }
  0xe5   : > { %1035 = vmatprep.subr.mxu0 %v4196_v39  ;;  %1205 = vmatprep.subr.mxu1 %v4197_v62  ;;  %v4203_v39 = vld [vmem:[#allocation51_spill] sm:$0xff]  ;;  %v3432_v62 = vsub.f32 %v256_v60, %v3415_v52  ;;  %v4209_v60 = vld [vmem:[#allocation57_spill] sm:$0xff] }
  0xe6   : > { %1038 = vmatpush2.msra.mxu0 %v4198_v29  ;;  %1207 = vmatpush2.msra.mxu1 %v4199_v28  ;;  %v3438_v28 = vsub.f32 %v242_v30, %v3422_v18  ;;  %v4212_v30 = vld [vmem:[#allocation90_spill] sm:$0xff]  ;;  %v4219_v29 = vld [vmem:[#allocation95_spill] sm:$0xff] }
  0xe7   : > { %1041 = vmatprep.subr.mxu0 %v4200_v19  ;;  %1209 = vmatprep.subr.mxu1 %v4201_v2  ;;  %v4207_v2 = vand.u32 4294901760, %v3409_v12  ;;  %v4213_v19 = vld [vmem:[#allocation61_spill] sm:$0xff] }
  0xe8   : > { %1044 = vmatpush2.msra.mxu0 %v4202_v56  ;;  %1211 = vmatpush2.msra.mxu1 %v4203_v39  ;;  %v4208_v56 = vld [vmem:[#allocation86_spill] sm:$0xff] }
  0xe9   : > { %1047 = vmatprep.subr.mxu0 %v4204_v1  ;;  %1213 = vmatprep.subr.mxu1 %v4205_v37  ;;  %v474_v39 = vsub.f32 %v3409_v12, %v4207_v2  ;;  %v4210_v1 = vld [vmem:[#allocation88_spill] sm:$0xff]  ;;  %v4211_v37 = vld [vmem:[#allocation59_spill] sm:$0xff]  ;;  %v4223_v2 = vld [vmem:[#allocation69_spill] sm:$0xff] }
  0xea   : > { %1050 = vmatpush2.msra.mxu0 %v3072_v47  ;;  %1215 = vmatpush2.msra.mxu1 %v4206_v36  ;;  %v4214_v36 = vand.u32 4294901760, %v3420_v43 }
  0xeb   : > { %1053 = vmatprep.subr.mxu0 %v4208_v56  ;;  %1217 = vmatprep.subr.mxu1 %v4209_v60  ;;  %v4216_v56 = vld [vmem:[#allocation63_spill] sm:$0xff]  ;;  %v475_v60 = vand.u32 4294901760, %v474_v39 }
  0xec   : > { %1056 = vmatpush2.msra.mxu0 %v4210_v1  ;;  %1219 = vmatpush2.msra.mxu1 %v4211_v37  ;;  %v480_v47 = vsub.f32 %v3420_v43, %v4214_v36  ;;  %v4217_v1 = vld [vmem:[#allocation93_spill] sm:$0xff] }
  0xed   : > { %1059 = vmatprep.subr.mxu0 %v4212_v30  ;;  %1221 = vmatprep.subr.mxu1 %v4213_v19  ;;  %v4218_v37 = vld [vmem:[#allocation65_spill] sm:$0xff]  ;;  %v4220_v30 = vld [vmem:[#allocation67_spill] sm:$0xff]  ;;  %v4221_v19 = vand.u32 4294901760, %v3432_v62 }
  0xee   : > { %1062 = vmatpush2.msra.mxu0 %v4215_v24  ;;  %1223 = vmatpush2.msra.mxu1 %v4216_v56  ;;  %v4222_v36 = vld [vmem:[#allocation97_spill] sm:$0xff]  ;;  %v481_v24 = vand.u32 4294901760, %v480_v47  ;;  %v4224_v56 = vand.u32 4294901760, %v3438_v28 }
  0xef   : > { %1065 = vmatprep.subr.mxu0 %v4217_v1  ;;  %1225 = vmatprep.subr.mxu1 %v4218_v37  ;;  %v490_v49 = vsub.f32 %v3432_v62, %v4221_v19  ;;  %v4225_v37 = vld [vmem:[#allocation71_spill] sm:$0xff] }
  0xf0   : > { %1068 = vmatpush2.msra.mxu0 %v4219_v29  ;;  %1227 = vmatpush2.msra.mxu1 %v4220_v30  ;;  %v496_v39 = vsub.f32 %v3438_v28, %v4224_v56  ;;  %v4226_v30 = vld [vmem:[#allocation73_spill] sm:$0xff] }
  0xf1   : > { %1071 = vmatprep.subr.mxu0 %v4222_v36  ;;  %1229 = vmatprep.subr.mxu1 %v4223_v2  ;;  %v491_v19 = vand.u32 4294901760, %v490_v49  ;;  %v4227_v2 = vld [vmem:[#allocation75_spill] sm:$0xff]  ;;  %v4228_v56 = vld [vmem:[#allocation77_spill] sm:$0xff] }
  0xf2   : > { %1074 = vmatpush2.msra.mxu0 %v3184_v61  ;;  %476 = vmatprep.mubr.f32.mxu0 %v475_v60  ;;  %v497_v47 = vand.u32 4294901760, %v496_v39  ;;  %v4229_v60 = vld [vmem:[#allocation79_spill] sm:$0xff]  ;;  %v4232_v39 = vld [vmem:[#allocation85_spill] sm:$0xff] }
  0xf3   : > { %1077 = vmatprep.subr.mxu0 %v3206_v46  ;;  %1231 = vmatpush2.msra.mxu1 %v4225_v37  ;;  %v4231_v49 = vld [vmem:[#allocation83_spill] sm:$0xff] }
  0xf4   : > { %1080 = vmatpush2.msra.mxu0 %v3220_v32  ;;  %1233 = vmatprep.subr.mxu1 %v4226_v30 }
  0xf5   : > { %482 = vmatmul.mubr.f32.gmra.mxu0 %v481_v24  ;;  %1083 = vmatprep.subr.mxu0 %v3232_v20  ;;  %v4230_v24 = vld [vmem:[#allocation81_spill] sm:$0xff] }
  0xf6   : > { %1086 = vmatpush2.msra.mxu0 %v3244_v38  ;;  %1235 = vmatpush2.msra.mxu1 %v4227_v2 }
  0xf7   : > { %1089 = vmatprep.subr.mxu0 %v3259_v53  ;;  %1237 = vmatprep.subr.mxu1 %v4228_v56 }
  0xf8   : > { %492 = vmatprep.mubr.f32.mxu0 %v491_v19  ;;  %1092 = vmatpush2.msra.mxu0 %v3269_v41  ;;  %v4233_v19 = vld [vmem:[#allocation89_spill] sm:$0xff] }
  0xf9   : > { %1239 = vmatpush2.msra.mxu1 %v4229_v60  ;;  %498 = vmatmul.mubr.f32.gmra.mxu0 %v497_v47  ;;  %v4234_v47 = vld [vmem:[#allocation12_spill] sm:$0xff] }
  0xfa   : > { %897 = vmatprep.mubr.f32.mxu1 %v3395_v13  ;;  %1095 = vmatprep.subr.mxu0 %v3281_v14  ;;  %v4236_v13 = vld [vmem:[#allocation91_spill] sm:$0xff] }
  0xfb   : > { %1241 = vmatprep.subr.mxu1 %v4230_v24  ;;  %899 = vmatmul.mubr.f32.gmra.mxu1 %v3404_v27  ;;  %v4235_v27 = vand.u32 4294901760, %v4234_v47  ;;  %v4242_v47 = vand.u32 4294901760, %v2493_v35  ;;  %v4248_v35 = vand.u32 4294901760, %v2546_v59  ;;  %v4253_v59 = vand.u32 4294901760, %v3409_v12 }
  0xfc   : > { %1098 = vmatpush2.msra.mxu0 %v3287_v51  ;;  %1243 = vmatpush2.msra.mxu1 %v4231_v49 }
  0xfd   : > { %1101 = vmatprep.subr.mxu0 %v3303_v7  ;;  %1245 = vmatprep.subr.mxu1 %v4232_v39  ;;  %v4237_v39 = vand.u32 4294901760, %v2464_v23  ;;  %v4243_v23 = vld [vmem:[#allocation98_spill] sm:$0xff] }
  0xfe   : > { %1104 = vmatpush2.msra.mxu0 %v3313_v44  ;;  %1107 = vmatprep.mubr.f32.mxu0 %v3262_v50 }
  0xff   : > { %1247 = vmatpush2.msra.mxu1 %v3101_v21  ;;  %905 = vmatprep.mubr.f32.mxu1 %v3415_v52  ;;  %v4238_v21 = vand.u32 4294901760, %v2470_v25  ;;  %v4239_v52 = vld [vmem:[#allocation94_spill] sm:$0xff]  ;;  %v4245_v25 = vld [vmem:[#allocation99_spill] sm:$0xff] }
 0x100   : > { %1110 = vmatmul.mubr.f32.vlgmr.msra.gmra.mxu0 %v3273_v26  ;;  %1249 = vmatprep.subr.mxu1 %v4233_v19  ;;  %v4240_v19 = vand.u32 4294901760, %v2484_v31  ;;  %v4247_v31 = vand.u32 4294901760, %v3262_v50  ;;  %v4252_v50 = vand.u32 4294901760, %v2580_v42  ;;  %v4262_v42 = vand.u32 4294901760, %v3438_v28 }
 0x101   : > { %1304 = vmatprep.subr.mxu0 %v4235_v27  ;;  %907 = vmatmul.mubr.f32.gmra.mxu1 %v3422_v18  ;;  %v4241_v27 = vld [vmem:[#allocation96_spill] sm:$0xff] }
 0x102   : > { %1251 = vmatpush2.msra.mxu1 %v4236_v13  ;;  %1308 = vmatpush1.msra.mxu0 %v4237_v39  ;;  %v4244_v39 = vand.u32 4294901760, %v2506_v40  ;;  %v4249_v40 = vand.u32 4294901760, %v3273_v26  ;;  %v4254_v26 = vand.u32 4294901760, %v2592_v48 }
 0x103   : > { %1253 = vmatprep.subr.mxu1 %v3138_v34  ;;  %1312 = vmatprep.subr.mxu0 %v4238_v21  ;;  %v4246_v21 = vand.u32 4294901760, %v2520_v45  ;;  %v4251_v45 = vand.u32 4294901760, %v2569_v8  ;;  %v4260_v8 = vand.u32 4294901760, %v2652_v63  ;;  %v4269_v63 = vld [vmem:[#allocation14_spill] sm:$0xff] }
 0x104   : > { %1117 = vmatprep.mubr.f32.mxu0 %v3409_v12  ;;  %1255 = vmatpush2.msra.mxu1 %v4239_v52 }
 0x105   : > { %1316 = vmatpush1.msra.mxu0 %v4240_v19  ;;  %1257 = vmatprep.subr.mxu1 %v4241_v27  ;;  %v4250_v19 = vand.u32 4294901760, %v2558_v0  ;;  %v4256_v0 = vand.u32 4294901760, %v3420_v43 }
 0x106   : > { %1120 = vmatmul.mubr.f32.gmra.mxu0 %v3420_v43  ;;  %1320 = vmatprep.subr.mxu0 %v4242_v47  ;;  %v4272_v43 = vld [vmem:[#allocation15_spill] sm:$0xff]  ;;  %v4279_v47 = vld [vmem:[#allocation40_spill] sm:$0xff] }
 0x107   : > { %1259 = vmatpush2.msra.mxu1 %v4243_v23  ;;  %1324 = vmatpush1.msra.mxu0 %v4244_v39  ;;  %v4280_v39 = vand.u32 4294901760, %v4279_v47  ;;  %v4314_v47 = vld [vmem:[#allocation29_spill] sm:$0xff] }
 0x108   : > { %1261 = vmatprep.subr.mxu1 %v4245_v25  ;;  %1328 = vmatprep.subr.mxu0 %v4246_v21  ;;  %v4281_v21 = vld [vmem:[#allocation18_spill] sm:$0xff] }
 0x109   : > { %1127 = vmatprep.mubr.f32.mxu0 %v3432_v62  ;;  %1263 = vmatpush2.msra.mxu1 %v3216_v33 }
 0x10a   : > { %1267 = vmatprep.mubr.f32.mxu1 %v4247_v31  ;;  %1332 = vmatpush1.msra.mxu0 %v4248_v35  ;;  %v4282_v31 = vld [vmem:[#allocation42_spill] sm:$0xff] }
 0x10b   : > { %1130 = vmatmul.mubr.f32.gmra.mxu0 %v3438_v28  ;;  %1271 = vmatmul.mubr.f32.vlgmr.msra.gmra.mxu1 %v4249_v40  ;;  %v4278_v28 = vld [vmem:[#allocation17_spill] sm:$0xff]  ;;  %v4283_v35 = vand.u32 4294901760, %v4282_v31  ;;  %v4284_v40 = vld [vmem:[#allocation19_spill] sm:$0xff] }
 0x10c   : > { %1336 = vmatprep.subr.mxu0 %v4250_v19  ;;  %1583 = vmatprep.subr.mxu1 %v2431_v3  ;;  %v4255_v3 = vand.u32 4294901760, %v2606_v57  ;;  %v4267_v57 = vld [vmem:[#allocation32_spill] sm:$0xff]  ;;  %v4317_v31 = vld [vmem:[#allocation31_spill] sm:$0xff] }
 0x10d   : > { %1340 = vmatpush1.msra.mxu0 %v4251_v45  ;;  %1585 = vmatpush1.msra.mxu1 %v2433_v4  ;;  %v4257_v4 = vand.u32 4294901760, %v2618_v6  ;;  %v4270_v6 = vld [vmem:[#allocation34_spill] sm:$0xff]  ;;  %v4285_v19 = vld [vmem:[#allocation44_spill] sm:$0xff] }
 0x10e   : > { %1344 = vmatprep.subr.mxu0 %v4252_v50  ;;  %1587 = vmatprep.subr.mxu1 %v2435_v5  ;;  %v4258_v5 = vand.u32 4294901760, %v2639_v54  ;;  %v4266_v54 = vld [vmem:[#allocation13_spill] sm:$0xff]  ;;  %v4286_v45 = vand.u32 4294901760, %v4285_v19  ;;  %v4287_v50 = vld [vmem:[#allocation20_spill] sm:$0xff] }
 0x10f   : > { %1279 = vmatprep.mubr.f32.mxu1 %v4253_v59  ;;  %1348 = vmatpush1.msra.mxu0 %v4254_v26  ;;  %v4288_v59 = vld [vmem:[#allocation46_spill] sm:$0xff]  ;;  %v4320_v19 = vld [vmem:[#allocation33_spill] sm:$0xff] }
 0x110   : > { %1589 = vmatpush1.msra.mxu1 %v2437_v9  ;;  %1352 = vmatprep.subr.mxu0 %v4255_v3  ;;  %v4259_v9 = vand.u32 4294901760, %v3432_v62  ;;  %v4275_v62 = vld [vmem:[#allocation16_spill] sm:$0xff]  ;;  %v4289_v26 = vand.u32 4294901760, %v4288_v59  ;;  %v4290_v3 = vld [vmem:[#allocation21_spill] sm:$0xff]  ;;  %v4323_v59 = vld [vmem:[#allocation35_spill] sm:$0xff] }
 0x111   : > { %1283 = vmatmul.mubr.f32.gmra.mxu1 %v4256_v0  ;;  %1591 = vmatprep.subr.mxu1 %v2439_v10  ;;  %v4261_v10 = vand.u32 4294901760, %v2670_v55  ;;  %v4271_v55 = vand.u32 4294901760, %v4270_v6  ;;  %v4291_v0 = vld [vmem:[#allocation48_spill] sm:$0xff]  ;;  %v4305_v6 = vld [vmem:[#allocation26_spill] sm:$0xff] }
 0x112   : > { %1356 = vmatpush1.msra.mxu0 %v4257_v4  ;;  %1593 = vmatpush1.msra.mxu1 %v2441_v11  ;;  %v4263_v11 = vand.u32 4294901760, %v2683_v58  ;;  %v4292_v4 = vand.u32 4294901760, %v4291_v0  ;;  %v4326_v0 = vld [vmem:[#allocation37_spill] sm:$0xff] }
 0x113   : > { %1360 = vmatprep.subr.mxu0 %v4258_v5  ;;  %1595 = vmatprep.subr.mxu1 %v2444_v15  ;;  %v4264_v15 = vld [vmem:[#allocation30_spill] sm:$0xff] }
 0x114   : > { %1291 = vmatprep.mubr.f32.mxu1 %v4259_v9  ;;  %1364 = vmatpush1.msra.mxu0 %v4260_v8  ;;  %v4265_v48 = vand.u32 4294901760, %v4264_v15  ;;  %v4293_v5 = vld [vmem:[#allocation22_spill] sm:$0xff]  ;;  %v4299_v15 = vld [vmem:[#allocation24_spill] sm:$0xff] }
 0x115   : > { %1597 = vmatpush1.msra.mxu1 %v2446_v16  ;;  %1368 = vmatprep.subr.mxu0 %v4261_v10  ;;  %v4268_v16 = vand.u32 4294901760, %v4267_v57  ;;  %v4294_v9 = vld [vmem:[#allocation50_spill] sm:$0xff]  ;;  %v4296_v10 = vld [vmem:[#allocation23_spill] sm:$0xff]  ;;  %v4302_v57 = vld [vmem:[#allocation25_spill] sm:$0xff] }
 0x116   : > { %1295 = vmatmul.mubr.f32.gmra.mxu1 %v4262_v42  ;;  %1599 = vmatprep.subr.mxu1 %v2448_v17  ;;  %v4273_v17 = vld [vmem:[#allocation36_spill] sm:$0xff]  ;;  %v4295_v8 = vand.u32 4294901760, %v4294_v9  ;;  %v4329_v9 = vld [vmem:[#allocation39_spill] sm:$0xff] }
 0x117   : > { %1372 = vmatpush1.msra.mxu0 %v4263_v11  ;;  %1601 = vmatpush1.msra.mxu1 %v2461_v22  ;;  %v4274_v58 = vand.u32 4294901760, %v4273_v17  ;;  %v4276_v22 = vld [vmem:[#allocation38_spill] sm:$0xff]  ;;  %v4297_v42 = vld [vmem:[#allocation52_spill] sm:$0xff]  ;;  %v4308_v17 = vld [vmem:[#allocation27_spill] sm:$0xff] }
 0x118   : > { %1376 = vmatprep.subr.mxu0 %v4265_v48  ;;  %1603 = vmatprep.subr.mxu1 %v4266_v54  ;;  %v4277_v12 = vand.u32 4294901760, %v4276_v22  ;;  %v4298_v11 = vand.u32 4294901760, %v4297_v42  ;;  %v4300_v48 = vld [vmem:[#allocation54_spill] sm:$0xff]  ;;  %v4311_v22 = vld [vmem:[#allocation28_spill] sm:$0xff]  ;;  %v4332_v42 = vld [vmem:[#allocation41_spill] sm:$0xff] }
 0x119   : > { %1380 = vmatpush1.msra.mxu0 %v4268_v16  ;;  %1605 = vmatpush1.msra.mxu1 %v4269_v63  ;;  %v4301_v54 = vand.u32 4294901760, %v4300_v48  ;;  %v4303_v16 = vld [vmem:[#allocation56_spill] sm:$0xff]  ;;  %v4335_v48 = vld [vmem:[#allocation43_spill] sm:$0xff] }
 0x11a   : > { %1384 = vmatprep.subr.mxu0 %v4271_v55  ;;  %1607 = vmatprep.subr.mxu1 %v4272_v43  ;;  %v4304_v63 = vand.u32 4294901760, %v4303_v16  ;;  %v4306_v55 = vld [vmem:[#allocation58_spill] sm:$0xff]  ;;  %v4338_v16 = vld [vmem:[#allocation45_spill] sm:$0xff] }
 0x11b   : > { %1388 = vmatpush1.msra.mxu0 %v4274_v58  ;;  %1609 = vmatpush1.msra.mxu1 %v4275_v62  ;;  %v4307_v43 = vand.u32 4294901760, %v4306_v55  ;;  %v4309_v58 = vld [vmem:[#allocation60_spill] sm:$0xff]  ;;  %v4341_v55 = vld [vmem:[#allocation47_spill] sm:$0xff] }
 0x11c   : > { %1392 = vmatprep.subr.mxu0 %v4277_v12  ;;  %1611 = vmatprep.subr.mxu1 %v4278_v28  ;;  %v4310_v62 = vand.u32 4294901760, %v4309_v58  ;;  %v4312_v12 = vld [vmem:[#allocation62_spill] sm:$0xff]  ;;  %v4344_v58 = vld [vmem:[#allocation49_spill] sm:$0xff] }
 0x11d   : > { %1396 = vmatpush1.msra.mxu0 %v4280_v39  ;;  %1613 = vmatpush1.msra.mxu1 %v4281_v21  ;;  %v4313_v28 = vand.u32 4294901760, %v4312_v12  ;;  %v4315_v39 = vld [vmem:[#allocation64_spill] sm:$0xff]  ;;  %v4347_v12 = vld [vmem:[#allocation51_spill] sm:$0xff] }
 0x11e   : > { %1400 = vmatprep.subr.mxu0 %v4283_v35  ;;  %1615 = vmatprep.subr.mxu1 %v4284_v40  ;;  %v4316_v21 = vand.u32 4294901760, %v4315_v39  ;;  %v4318_v35 = vld [vmem:[#allocation66_spill] sm:$0xff]  ;;  %v4350_v39 = vld [vmem:[#allocation53_spill] sm:$0xff] }
 0x11f   : > { %1404 = vmatpush1.msra.mxu0 %v4286_v45  ;;  %1617 = vmatpush1.msra.mxu1 %v4287_v50  ;;  %v4319_v40 = vand.u32 4294901760, %v4318_v35  ;;  %v4321_v45 = vld [vmem:[#allocation68_spill] sm:$0xff]  ;;  %v4353_v35 = vld [vmem:[#allocation55_spill] sm:$0xff] }
 0x120   : > { %1408 = vmatprep.subr.mxu0 %v4289_v26  ;;  %1619 = vmatprep.subr.mxu1 %v4290_v3  ;;  %v4322_v50 = vand.u32 4294901760, %v4321_v45  ;;  %v4324_v26 = vld [vmem:[#allocation70_spill] sm:$0xff]  ;;  %v4356_v45 = vld [vmem:[#allocation57_spill] sm:$0xff] }
 0x121   : > { %1412 = vmatpush1.msra.mxu0 %v4292_v4  ;;  %1621 = vmatpush1.msra.mxu1 %v4293_v5  ;;  %v4325_v3 = vand.u32 4294901760, %v4324_v26  ;;  %v4327_v4 = vld [vmem:[#allocation72_spill] sm:$0xff]  ;;  %v4359_v26 = vld [vmem:[#allocation59_spill] sm:$0xff] }
 0x122   : > { %1416 = vmatprep.subr.mxu0 %v4295_v8  ;;  %1623 = vmatprep.subr.mxu1 %v4296_v10  ;;  %v4328_v5 = vand.u32 4294901760, %v4327_v4  ;;  %v4330_v8 = vld [vmem:[#allocation74_spill] sm:$0xff]  ;;  %v4362_v4 = vand.u32 4294901760, %v4219_v29  ;;  %v4370_v29 = vand.u32 4294901760, %v3220_v32  ;;  %v4374_v32 = vand.u32 4294901760, %v3269_v41 }
 0x123   : > { %1420 = vmatpush1.msra.mxu0 %v4298_v11  ;;  %1625 = vmatpush1.msra.mxu1 %v4299_v15  ;;  %v4331_v10 = vand.u32 4294901760, %v4330_v8  ;;  %v4333_v11 = vld [vmem:[#allocation76_spill] sm:$0xff]  ;;  %v4365_v8 = vld [vmem:[#allocation65_spill] sm:$0xff]  ;;  %v4379_v41 = vand.u32 4294901760, %v3313_v44 }
 0x124   : > { %1424 = vmatprep.subr.mxu0 %v4301_v54  ;;  %1627 = vmatprep.subr.mxu1 %v4302_v57  ;;  %v4334_v15 = vand.u32 4294901760, %v4333_v11  ;;  %v4336_v54 = vld [vmem:[#allocation78_spill] sm:$0xff]  ;;  %v4369_v11 = vld [vmem:[#allocation69_spill] sm:$0xff] }
 0x125   : > { %1428 = vmatpush1.msra.mxu0 %v4304_v63  ;;  %1629 = vmatpush1.msra.mxu1 %v4305_v6  ;;  %v4337_v57 = vand.u32 4294901760, %v4336_v54  ;;  %v4339_v63 = vld [vmem:[#allocation80_spill] sm:$0xff]  ;;  %v4385_v44 = vld [vmem:[#allocation105_spill] sm:$0xff] }
 0x126   : > { %1432 = vmatprep.subr.mxu0 %v4307_v43  ;;  %1631 = vmatprep.subr.mxu1 %v4308_v17  ;;  %v4340_v6 = vand.u32 4294901760, %v4339_v63  ;;  %v4342_v43 = vld [vmem:[#allocation82_spill] sm:$0xff] }
 0x127   : > { %1436 = vmatpush2.msra.mxu0 %v4310_v62  ;;  %1633 = vmatpush1.msra.mxu1 %v4311_v22  ;;  %v4343_v17 = vand.u32 4294901760, %v4342_v43  ;;  %v4345_v62 = vld [vmem:[#allocation84_spill] sm:$0xff] }
 0x128   : > { %1440 = vmatprep.subr.mxu0 %v4313_v28  ;;  %1635 = vmatprep.subr.mxu1 %v4314_v47  ;;  %v4346_v22 = vand.u32 4294901760, %v4345_v62  ;;  %v4348_v28 = vld [vmem:[#allocation86_spill] sm:$0xff]  ;;  %v1772_v62 = vstv %s1997_s27 }
 0x129   : > { %1444 = vmatpush2.msra.mxu0 %v4316_v21  ;;  %1637 = vmatpush1.msra.mxu1 %v4317_v31  ;;  %v4349_v47 = vand.u32 4294901760, %v4348_v28  ;;  %v4351_v21 = vld [vmem:[#allocation88_spill] sm:$0xff]  ;;  %v2233_v28 = vmov 839922192  }
 0x12a   : > { %1448 = vmatprep.subr.mxu0 %v4319_v40  ;;  %1639 = vmatprep.subr.mxu1 %v4320_v19  ;;  %v4352_v31 = vand.u32 4294901760, %v4351_v21  ;;  %v4354_v40 = vld [vmem:[#allocation90_spill] sm:$0xff] }
 0x12b   : > { %1452 = vmatpush2.msra.mxu0 %v4322_v50  ;;  %1641 = vmatpush1.msra.mxu1 %v4323_v59  ;;  %v4355_v19 = vand.u32 4294901760, %v4354_v40  ;;  %v4357_v50 = vld [vmem:[#allocation92_spill] sm:$0xff] }
 0x12c   : > { %1456 = vmatprep.subr.mxu0 %v4325_v3  ;;  %1643 = vmatprep.subr.mxu1 %v4326_v0  ;;  %v4358_v59 = vand.u32 4294901760, %v4357_v50  ;;  %v4360_v3 = vand.u32 4294901760, %v4217_v1  ;;  %v4361_v0 = vld [vmem:[#allocation61_spill] sm:$0xff]  ;;  %v4368_v1 = vand.u32 4294901760, %v3206_v46  ;;  %v4373_v46 = vand.u32 4294901760, %v3259_v53 }
 0x12d   : > { %1460 = vmatpush2.msra.mxu0 %v4328_v5  ;;  %1645 = vmatpush1.msra.mxu1 %v4329_v9  ;;  %v4363_v5 = vld [vmem:[#allocation63_spill] sm:$0xff]  ;;  %v4364_v9 = vand.u32 4294901760, %v4222_v36  ;;  %v4371_v36 = vand.u32 4294901760, %v3232_v20  ;;  %v4375_v20 = vand.u32 4294901760, %v3281_v14  ;;  %v4377_v53 = vand.u32 4294901760, %v3303_v7  ;;  %v4386_v7 = vld [vmem:[#allocation106_spill] sm:$0xff] }
 0x12e   : > { %1464 = vmatprep.subr.mxu0 %v4331_v10  ;;  %1647 = vmatprep.subr.mxu1 %v4332_v42  ;;  %v4366_v10 = vand.u32 4294901760, %v3184_v61  ;;  %v4367_v42 = vld [vmem:[#allocation67_spill] sm:$0xff]  ;;  %v4372_v61 = vand.u32 4294901760, %v3244_v38  ;;  %v4376_v38 = vand.u32 4294901760, %v3287_v51  ;;  %v4384_v51 = vld [vmem:[#allocation104_spill] sm:$0xff] }
 0x12f   : > { %1468 = vmatpush2.msra.mxu0 %v4334_v15  ;;  %1649 = vmatpush2.msra.mxu1 %v4335_v48  ;;  %v4382_v14 = vld [vmem:[#allocation103_spill] sm:$0xff] }
 0x130   : > { %1472 = vmatprep.subr.mxu0 %v4337_v57  ;;  %1651 = vmatprep.subr.mxu1 %v4338_v16 }
 0x131   : > { %1476 = vmatpush2.msra.mxu0 %v4340_v6  ;;  %1653 = vmatpush2.msra.mxu1 %v4341_v55 }
 0x132   : > { %1480 = vmatprep.subr.mxu0 %v4343_v17  ;;  %1655 = vmatprep.subr.mxu1 %v4344_v58 }
 0x133   : > { %1484 = vmatpush2.msra.mxu0 %v4346_v22  ;;  %1657 = vmatpush2.msra.mxu1 %v4347_v12 }
 0x134   : > { %1488 = vmatprep.subr.mxu0 %v4349_v47  ;;  %1659 = vmatprep.subr.mxu1 %v4350_v39  ;;  %v1779_v47 = vunpack.c.l.s4 %v2233_v28 }
 0x135   : > { %1492 = vmatpush2.msra.mxu0 %v4352_v31  ;;  %1661 = vmatpush2.msra.mxu1 %v4353_v35 }
 0x136   : > { %1496 = vmatprep.subr.mxu0 %v4355_v19  ;;  %1663 = vmatprep.subr.mxu1 %v4356_v45  ;;  %v1780_v40 = vunpack.c.0.s8 %v1779_v47 }
 0x137   : > { %1500 = vmatpush2.msra.mxu0 %v4358_v59  ;;  %1665 = vmatpush2.msra.mxu1 %v4359_v26 }
 0x138   : > { %1504 = vmatprep.subr.mxu0 %v4360_v3  ;;  %1667 = vmatprep.subr.mxu1 %v4361_v0  ;;  %v4387_v0 = vld [vmem:[#allocation101_spill] sm:$0xff] }
 0x139   : > { %1508 = vmatpush2.msra.mxu0 %v4362_v4  ;;  %1669 = vmatpush2.msra.mxu1 %v4363_v5  ;;  %v4388_v4 = vld [vmem:[#allocation100_spill] sm:$0xff] }
 0x13a   : > { %1512 = vmatprep.subr.mxu0 %v4364_v9  ;;  %1671 = vmatprep.subr.mxu1 %v4365_v8  ;;  %v239_v5 = vsub.f32 %v4388_v4, %v4387_v0  ;;  %v2234_v9 = vmov 0.0  }
 0x13b   : > { %1516 = vmatpush2.msra.mxu0 %v4366_v10  ;;  %1673 = vmatpush2.msra.mxu1 %v4367_v42 }
 0x13c   : > { %1520 = vmatprep.subr.mxu0 %v4368_v1  ;;  %1675 = vmatprep.subr.mxu1 %v4369_v11 }
 0x13d   : > { %1524 = vmatpush2.msra.mxu0 %v4370_v29  ;;  %1677 = vmatpush2.msra.mxu1 %v4225_v37  ;;  %v4378_v37 = vld [vmem:[#allocation85_spill] sm:$0xff] }
 0x13e   : > { %1528 = vmatprep.subr.mxu0 %v4371_v36  ;;  %1679 = vmatprep.subr.mxu1 %v4226_v30  ;;  %v4380_v30 = vld [vmem:[#allocation102_spill] sm:$0xff] }
 0x13f   : > { %1532 = vmatpush2.msra.mxu0 %v4372_v61  ;;  %1681 = vmatpush2.msra.mxu1 %v4227_v2  ;;  %v4381_v2 = vld [vmem:[#allocation87_spill] sm:$0xff] }
 0x140   : > { %1536 = vmatprep.subr.mxu0 %v4373_v46  ;;  %1683 = vmatprep.subr.mxu1 %v4228_v56  ;;  %v4383_v56 = vld [vmem:[#allocation89_spill] sm:$0xff] }
 0x141   : > { %1540 = vmatpush2.msra.mxu0 %v4374_v32  ;;  %1685 = vmatpush2.msra.mxu1 %v4229_v60 }
 0x142   : > { %1544 = vmatprep.subr.mxu0 %v4375_v20  ;;  %1687 = vmatprep.subr.mxu1 %v4230_v24 }
 0x143   : > { %1548 = vmatpush2.msra.mxu0 %v4376_v38  ;;  %1689 = vmatpush2.msra.mxu1 %v4231_v49 }
 0x144   : > { %1552 = vmatprep.subr.mxu0 %v4377_v53  ;;  %1691 = vmatprep.subr.mxu1 %v4378_v37 }
 0x145   : > { %1556 = vmatpush2.msra.mxu0 %v4379_v41  ;;  %1558 = vmatprep.mubr.f32.mxu0 %v4380_v30  ;;  %v1822_v41 = vmul.f32 %v239_v5, %v239_v5 }
 0x146   : > { %1693 = vmatpush2.msra.mxu1 %v4381_v2  ;;  %1560 = vmatmul.mubr.f32.vlgmr.msra.gmra.mxu0 %v4382_v14 }
 0x147   : > { %1695 = vmatprep.subr.mxu1 %v4383_v56  ;;  %1566 = vmatprep.mubr.f32.mxu0 %v4384_v51 }
 0x148   : > { %1697 = vmatpush2.msra.mxu1 %v4236_v13  ;;  %1711 = vmatprep.mubr.f32.mxu1 %v4380_v30 }
 0x149   : > { %1699 = vmatprep.subr.mxu1 %v3138_v34 }
 0x14a   : > { %1701 = vmatpush2.msra.mxu1 %v4239_v52  ;;  %1568 = vmatmul.mubr.f32.gmra.mxu0 %v4385_v44 }
 0x14b   : > { %1703 = vmatprep.subr.mxu1 %v4241_v27  ;;  %1574 = vmatprep.mubr.f32.mxu0 %v4386_v7 }
 0x14c   : > { %1705 = vmatpush2.msra.mxu1 %v4243_v23 }
 0x14d   : > { %1707 = vmatprep.subr.mxu1 %v4245_v25 }
 0x14e   : > { %1709 = vmatpush2.msra.mxu1 %v3216_v33  ;;  %1576 = vmatmul.mubr.f32.gmra.mxu0 %v3422_v18 }
 0x14f   : > { %1713 = vmatmul.mubr.f32.vlgmr.msra.gmra.mxu1 %v4382_v14 }
 0x150   : > { %1719 = vmatprep.mubr.f32.mxu1 %v4384_v51 }
 0x153   : > { %1721 = vmatmul.mubr.f32.gmra.mxu1 %v4385_v44 }
 0x154   : > { %1727 = vmatprep.mubr.f32.mxu1 %v4386_v7 }
 0x157   : > { %1729 = vmatmul.mubr.f32.gmra.mxu1 %v3422_v18  ;;  %v1770_v18 = vlaneseq }
 0x159   : > { %v3725_v58 = vshrl.u32 %v1770_v18, 7 }
 0x15b   : > { %v1773_v21 = vadd.s32 %v1772_v62, %v3725_v58  ;;  %v1783_v10 = vsub.s32 %v1780_v40, %v3725_v58 }
 0x15d   : > { %vm1774_vm1 = vcmp.lt.s32.totalorder %v1773_v21, 8 }
 0x15e   : > { %v1998_v8 = vsel %vm1774_vm1, 1.0, %v2234_v9 }
 0x15f   : > { %v3731_v37 = vrot.slane %v1998_v8, %v1783_v10 }
 0x17d   : > { %v467_v34 = vpop.f32.mrf.mxu0 }
 0x17f   : > { %v469_v52 = vpop.f32.mrf.mxu0 }
 0x182   : > { %v892_v24 = vpop.f32.mrf.mxu1 }
 0x183   : > { %v893_v19 = vadd.f32 %v892_v24, %v467_v34 }
 0x184   : > { %v894_v33 = vpop.f32.mrf.mxu1 }
 0x185   : > { %v895_v45 = vadd.f32 %v894_v33, %v469_v52 }
 0x1b5   : > { %v483_v13 = vpop.f32.mrf.mxu0 }
 0x1b7   : > { %v485_v60 = vpop.f32.mrf.mxu0 }
 0x1b9   : > { %v499_v49 = vpop.f32.mrf.mxu0 }
 0x1bb   : > { %v900_v27 = vpop.f32.mrf.mxu1  ;;  %v501_v23 = vpop.f32.mrf.mxu0 }
 0x1bc   : > { %v901_v42 = vadd.f32 %v900_v27, %v483_v13 }
 0x1bd   : > { %v902_v25 = vpop.f32.mrf.mxu1 }
 0x1be   : > { %v903_v1 = vadd.f32 %v902_v25, %v485_v60 }
 0x1c0   : > { %v1111_v15 = vpop.f32.mrf.mxu0 }
 0x1c1   : > { %v908_v48 = vpop.f32.mrf.mxu1  ;;  %v1112_v59 = vadd.f32 %v1111_v15, %v893_v19  ;;  %v1823_v15 = vmul.f32 %v1822_v41, %v3731_v37 }
 0x1c2   : > { %v1113_v54 = vpop.f32.mrf.mxu0  ;;  %v909_v44 = vadd.f32 %v908_v48, %v499_v49 }
 0x1c3   : > { %v910_v57 = vpop.f32.mrf.mxu1  ;;  %v1114_v26 = vadd.f32 %v1113_v54, %v895_v45  ;;  %v1827_v40 = vsel %vm258_vm0, %v1823_v15, 0.0 }
 0x1c4   : > { %v911_v7 = vadd.f32 %v910_v57, %v501_v23 }
 0x1c6   : > { %v1121_v16 = vpop.f32.mrf.mxu0 }
 0x1c7   : > { %v1122_v46 = vadd.f32 %v1121_v16, %v901_v42 }
 0x1c8   : > { %v1123_v6 = vpop.f32.mrf.mxu0 }
 0x1c9   : > { %v1124_v32 = vadd.f32 %v1123_v6, %v903_v1 }
 0x1cb   : > { %v1272_v63 = vpop.f32.mrf.mxu1  ;;  %v1131_v43 = vpop.f32.mrf.mxu0 }
 0x1cc   : > { %v1273_v11 = vadd.f32 %v1272_v63, %v1112_v59  ;;  %v1132_v33 = vadd.f32 %v1131_v43, %v909_v44 }
 0x1cd   : > { %v1274_v55 = vpop.f32.mrf.mxu1  ;;  %v1133_v22 = vpop.f32.mrf.mxu0 }
 0x1ce   : > { %v1275_v29 = vadd.f32 %v1274_v55, %v1114_v26  ;;  %v1134_v27 = vadd.f32 %v1133_v22, %v911_v7 }
 0x1d1   : > { %v1284_v17 = vpop.f32.mrf.mxu1 }
 0x1d2   : > { %v1285_v30 = vadd.f32 %v1284_v17, %v1122_v46 }
 0x1d3   : > { %v1286_v12 = vpop.f32.mrf.mxu1 }
 0x1d4   : > { %v1287_v2 = vadd.f32 %v1286_v12, %v1124_v32  ;;  %v1825_v12 = vcombine.high %v1823_v15, %v1823_v15 }
 0x1d6   : > { %v1296_v35 = vpop.f32.mrf.mxu1  ;;  %v1834_v59 = vsel %vm258_vm0, %v1825_v12, 0.0 }
 0x1d7   : > { %v1297_v62 = vadd.f32 %v1296_v35, %v1132_v33  ;;  %v1835_v0 = vrot.slane %v1834_v59, 4 }
 0x1d8   : > { %v1298_v3 = vpop.f32.mrf.mxu1 }
 0x1d9   : > { %v1299_v18 = vadd.f32 %v1298_v3, %v1134_v27  ;;  %v1828_v3 = vrot.slane %v1827_v40, 4  ;;  %v1836_v9 = vadd.f32 %v1835_v0, %v1834_v59 }
 0x1db   : > { %v1829_v5 = vadd.f32 %v1828_v3, %v1827_v40  ;;  %v1837_v1 = vrot.slane %v1836_v9, 2 }
 0x1dd   : > { %v1830_v42 = vrot.slane %v1829_v5, 2 }
 0x206   : > { %v1561_v39 = vpop.f32.mrf.mxu0 }
 0x207   : > { %v1562_v20 = vadd.f32 %v1561_v39, %v1273_v11 }
 0x208   : > { %v1563_v31 = vpop.f32.mrf.mxu0 }
 0x209   : > { %v1564_v38 = vadd.f32 %v1563_v31, %v1275_v29 }
 0x20a   : > { %v1569_v50 = vpop.f32.mrf.mxu0 }
 0x20b   : > { %v1570_v52 = vadd.f32 %v1569_v50, %v1285_v30 }
 0x20c   : > { %v1571_v36 = vpop.f32.mrf.mxu0 }
 0x20d   : > { %v1572_v13 = vadd.f32 %v1571_v36, %v1287_v2  ;;  %v1831_v36 = vadd.f32 %v1830_v42, %v1829_v5 }
 0x20e   : > { %v1577_v14 = vpop.f32.mrf.mxu0 }
 0x20f   : > { %v1714_v61 = vpop.f32.mrf.mxu1  ;;  %v1578_v28 = vadd.f32 %v1577_v14, %v1297_v62  ;;  %v1832_v41 = vrot.slane %v1831_v36, 1 }
 0x210   : > { %v1715_v56 = vadd.f32 %v1714_v61, %v1562_v20  ;;  %v1579_v54 = vpop.f32.mrf.mxu0  ;;  %v1838_v61 = vadd.f32 %v1837_v1, %v1836_v9 }
 0x211   : > { %v1716_v53 = vpop.f32.mrf.mxu1  ;;  %v1580_v48 = vadd.f32 %v1579_v54, %v1299_v18  ;;  %v1833_v7 = vadd.f32 %v1832_v41, %v1831_v36 }
 0x212   : > { %v1717_v51 = vadd.f32 %v1716_v53, %v1564_v38  ;;  %v2235_v38 = vmov 1966171168   ;;  %v1839_v30 = vrot.slane %v1838_v61, 1 }
 0x213   : > { %v1722_v34 = vpop.f32.mrf.mxu1  ;;  %v1808_v53 = vunpack.c.l.s4 %v2235_v38 }
 0x214   : > { %v1741_v60 = vcombine.low %v1715_v56, %v1717_v51  ;;  %v1742_v24 = vcombine.high %v1715_v56, %v1717_v51  ;;  %v1723_v6 = vadd.f32 %v1722_v34, %v1570_v52  ;;  %v1840_v34 = vadd.f32 %v1839_v30, %v1838_v61 }
 0x215   : > { %v1724_v25 = vpop.f32.mrf.mxu1  ;;  %v1809_v44 = vunpack.c.0.s8 %v1808_v53 }
 0x216   : > { %v1751_v16 = vmul.f32 %v1741_v60, %v1741_v60  ;;  %v1752_v63 = vmul.f32 %v1742_v24, %v1742_v24  ;;  %v1725_v55 = vadd.f32 %v1724_v25, %v1572_v13  ;;  %v1753_v35 = vmul.f32 %v1742_v24, %v1741_v60 }
 0x217   : > { %v1730_v17 = vpop.f32.mrf.mxu1  ;;  %v1812_v27 = vsub.s32 %v1809_v44, %v3725_v58  ;;  %v1843_v25 = vcombine.low %v1833_v7, %v1840_v34 }
 0x218   : > { %v1743_v49 = vcombine.low %v1723_v6, %v1725_v55  ;;  %v1744_v23 = vcombine.high %v1723_v6, %v1725_v55  ;;  %v1762_v47 = vadd.f32 %v1752_v63, %v1751_v16  ;;  %v1731_v31 = vadd.f32 %v1730_v17, %v1578_v28 }
 0x219   : > { %v1732_v57 = vpop.f32.mrf.mxu1  ;;  %v1757_v10 = vmul.f32 2.0, %v1753_v35 }
 0x21a   : > { %v1754_v43 = vsub.f32 %v1743_v49, %v1751_v16  ;;  %v1755_v22 = vsub.f32 %v1744_v23, %v1752_v63  ;;  %v1733_v39 = vadd.f32 %v1732_v57, %v1580_v48  ;;  %v1763_v19 = vadd.f32 0.0001, %v1762_v47 }
 0x21b   : > { %v1758_v29 = vadd.f32 0.0001, %v1757_v10  ;;  %v1850_v63 = vrot.slane %v1843_v25, %v1812_v27 }
 0x21c   : > { %v1764_v21 = vadd.f32 %v1755_v22, %v1754_v43  ;;  %v1745_v50 = vcombine.low %v1731_v31, %v1733_v39 }
 0x21d   : > { %v1857_v17 = vrot.slane %v1850_v63, %v1812_v27 }
 0x21e   : > { %v1765_v45 = vadd.f32 0.0009, %v1764_v21  ;;  %v1756_v4 = vsub.f32 %v1745_v50, %v1753_v35 }
 0x21f   : > { %v1860_v23 = vrot.slane %v1857_v17, 6 }
 0x220   : > { %v1766_v26 = vmul.f32 %v1765_v45, %v1763_v19  ;;  %v1759_v8 = vmul.f32 2.0, %v1756_v4 }
 0x222   : > { %2074 = vrcp.f32 %v1766_v26  ;;  %v1760_v11 = vadd.f32 0.0009, %v1759_v8 }
 0x224   : > { %v1761_v46 = vmul.f32 %v1760_v11, %v1758_v29 }
 0x22f   : > { %v2075_v32 = vpop.eup %2074 }
 0x230   : > { %v1768_v20 = vmul.f32 %v2075_v32, %v1761_v46 }
 0x232   : > { %v1786_v2 = vmul.f32 %v3731_v37, %v1768_v20 }
 0x234   : > { %v1788_v14 = vcombine.high %v1786_v2, %v1786_v2  ;;  %v1790_v56 = vsel %vm258_vm0, %v1786_v2, 0.0 }
 0x235   : > { %v1791_v51 = vrot.slane %v1790_v56, 4 }
 0x236   : > { %v1797_v52 = vsel %vm258_vm0, %v1788_v14, 0.0 }
 0x237   : > { %v1792_v13 = vadd.f32 %v1791_v51, %v1790_v56  ;;  %v1798_v60 = vrot.slane %v1797_v52, 4 }
 0x239   : > { %v1793_v24 = vrot.slane %v1792_v13, 2  ;;  %v1799_v33 = vadd.f32 %v1798_v60, %v1797_v52 }
 0x23b   : > { %v1794_v15 = vadd.f32 %v1793_v24, %v1792_v13  ;;  %v1800_v37 = vrot.slane %v1799_v33, 2 }
 0x23d   : > { %v1795_v54 = vrot.slane %v1794_v15, 1  ;;  %v1801_v16 = vadd.f32 %v1800_v37, %v1799_v33 }
 0x23f   : > { %v1802_v6 = vrot.slane %v1801_v16, 1  ;;  %v1796_v55 = vadd.f32 %v1795_v54, %v1794_v15 }
 0x241   : > { %v1803_v18 = vadd.f32 %v1802_v6, %v1801_v16 }
 0x243   : > { %v1806_v62 = vcombine.low %v1796_v55, %v1803_v18 }
 0x245   : > { %v1813_v49 = vrot.slane %v1806_v62, %v1812_v27 }
 0x247   : > { %v1820_v58 = vrot.slane %v1813_v49, %v1812_v27 }
 0x249   : > { %v1863_v48 = vsel %vm1862_vm2, %v1820_v58, %v1860_v23 }
 0x24a   : > { %v1864_v57 = vsel %vm258_vm0, %v1863_v48, 0.0 }
 0x24b   : > { %1865 = vst [vmem:[%s236_s21] sm:$0xff] %v1864_v57 }
 0x24c   : > { %2171 = shalt.err (!%p2168_p12)
}
 0x24d   : > { %s2172_s18 = scalar_lea.hbm %s3745_s8, 128  ;;  %s2176_s9 = scalar_lea.hbm %s3787_s3, 256 }
 0x24e   : > { %p2173_p7 = scmp.ne.s32.totalorder %s3745_s8, %s2172_s18  ;;  %p2177_p5 = scmp.lt.s32.totalorder %s3745_s8, %s3787_s3 }
 0x24f   : > { %p2178_p9 = scmp.lt.s32.totalorder %s2176_s9, %s2172_s18 }
 0x250   : > { %p2174_p0 = pnand %p2173_p7, %p4389_p8 }
 0x251   : > { %p2179_p10 = por %p2178_p9, %p2177_p5 }
 0x252   : > { %p2175_p6 = pneg %p2174_p0 }
 0x254   : > { %p2180_p11 = pnand %p2179_p10, %p2175_p6 }
 0x256   : > { %2183 = shalt.err (!%p2180_p11)
}
 0x257   : > { %2013 = dma.vmem_to_hbm [thread:$0]  (%p4389_p8), %s1881_s28, 128, %s3745_s8, %s1867_s11  }
 0x258 PF: > { %s1892_s24 = sand.u32 1, %s2214_s12   ;;  %p4390_p3 = scmp.ne.s32.totalorder %s4015_s26, 0 }
 0x259   : > { %p4391_p2 = scmp.ge.s32.totalorder %s2226_s15, 2  ;;  %s1893_s27 = scalar_lea.sflag [#allocation4], %s1892_s24 }
 0x25b   : > { %p2027_p4 = pnand %p4391_p2, %p4390_p3 }
 0x25d   : > { %p2028_p13 = pneg %p2027_p4 }
 0x25f   : > { %2209 = dma.done.wait (%p2028_p13), %s1893_s27, 128  }
 0x260   : > { %2211 = vsyncadd (%p2028_p13), %s1893_s27, 4294967168  ;;  %p17_p1 = scmp.ge.s32.totalorder %s2278_s16, 4   ;;  %s4392_s12 = smov %s2218_s13 }
 0x261   : > { %s4393_s13 = smov %s2222_s14  ;;  %s4394_s14 = smov %s2289_s19 }
 0x262   : > { %s4395_s15 = smov %s2278_s16  ;;  %19 = sbr.rel (!%p17_p1) target bundleno = 6 (0x6), region = 93 }
 0x267   :  { %1898 = vsyncpa [#allocation3], 1 }
 0x268   :  { %1900 = vsyncpa [#allocation3 + $0x1], 1 }
 0x269   :  { %1901 = vsyncpa [#allocation6], 1 }
 0x26a   :  { %1903 = vsyncpa [#allocation6 + $0x1], 1 }
 0x26b   :  { %1904 = vsyncpa [#allocation4], 1 }
 0x26c   :  { %1906 = vsyncpa [#allocation4 + $0x1], 1 }

</bundles_post_ra>
